<compile_context>
chip_gen: v7x
topology: tpu7x:2x2x1
jax: 0.10.0
libtpu: 0.0.40
codegen_flags: <defaults>
</compile_context>

<pallas_src>
import functools

import jax
import jax.numpy as jnp
from jax.experimental import pallas as pl
from jax.experimental.pallas import tpu as pltpu


# ----------------------------------------------------------------------------
# Single fused kernel: 2 lane-stacked bidirectional GRU layers + MLP head.
# Gate order inside each 2H-wide slab is [fwd | rev]; slab order is [r, z, n].
# ----------------------------------------------------------------------------
def fused_gru_head_kernel(
    xx0_ref,
    w0_ref, bi0_ref, whh0_ref, bhn0_ref,
    w1_ref, bi1_ref, whh1_ref, bhn1_ref,
    wh1_ref, bh1_ref, wh2_ref, bh2_ref,
    out_ref,
    y0_ref, y1_ref,                      # VMEM scratch
    *, T, Bp, H,
):
    f32 = jnp.float32
    H2, H4, H6 = 2 * H, 4 * H, 6 * H

    def run_layer(gi, whh_ref_, bhn_ref_, y_ref, write_rev_copy):
        # gi: (T*Bp, 6H) hoisted stacked input projection (r/z recurrent bias folded in).
        whh = whh_ref_[...]                                      # (2H, 6H) block-diag
        bhn = jnp.broadcast_to(bhn_ref_[...], (Bp, H2))          # hoisted broadcast
        hs = jnp.zeros((Bp, H2), f32)                            # [hf | hr]
        for t in range(T):                                       # static -> unrolled
            rt = T - 1 - t
            gh = jnp.dot(hs, whh, preferred_element_type=f32)    # one MXU op / step
            git = gi[t * Bp:(t + 1) * Bp, :]
            r = jax.nn.sigmoid(git[:, 0:H2] + gh[:, 0:H2])
            z = jax.nn.sigmoid(git[:, H2:H4] + gh[:, H2:H4])
            n = jnp.tanh(git[:, H4:H6] + r * (gh[:, H4:H6] + bhn))
            hs = n + z * (hs - n)                                # == (1-z)*n + z*h
            hf = hs[:, 0:H]
            hr = hs[:, H:H2]
            # Normal time order: fwd at t, rev at rt (aligned (Bp, H) sublane tiles).
            y_ref[t * Bp:(t + 1) * Bp, 0:H] = hf
            y_ref[rt * Bp:(rt + 1) * Bp, H:H2] = hr
            if write_rev_copy:
                # Time-reversed copy in cols [2H:4H] so the next layer's stacked
                # projection consumes [y(t) | y(T-1-t)] with zero per-step shuffles.
                y_ref[rt * Bp:(rt + 1) * Bp, H2:H2 + H] = hf
                y_ref[t * Bp:(t + 1) * Bp, H2 + H:H4] = hr

    # ----- layer 0: one hoisted stacked input projection -----
    gi0 = jnp.dot(xx0_ref[...], w0_ref[...], preferred_element_type=f32) + bi0_ref[...]
    run_layer(gi0, whh0_ref, bhn0_ref, y0_ref, True)

    # ----- layer 1 -----
    # TODO(synk): nn.GRU dropout=0.5 between layers is train-time only; omitted (eval).
    gi1 = jnp.dot(y0_ref[...], w1_ref[...], preferred_element_type=f32) + bi1_ref[...]
    run_layer(gi1, whh1_ref, bhn1_ref, y1_ref, False)

    # ----- head: relu(Linear(2H->L)) -> Linear(L->L) on the full (T*Bp, .) slab -----
    h = jnp.dot(y1_ref[...], wh1_ref[...], preferred_element_type=f32) + bh1_ref[...]
    h = jnp.maximum(h, 0.0)
    out_ref[...] = jnp.dot(h, wh2_ref[...], preferred_element_type=f32) + bh2_ref[...]


# ----------------------------------------------------------------------------
# One-time parameter repacking (outside the per-call path).
# ----------------------------------------------------------------------------
def _interleave_gate_cols(wf, wr, H):
    """Build (In_f+In_r, 6H) with wf hitting even gate slabs, wr odd gate slabs."""
    in_f, in_r = wf.shape[0], wr.shape[0]
    out = jnp.zeros((in_f + in_r, 6 * H), jnp.float32)
    for g in range(3):  # r, z, n
        out = out.at[:in_f, (2 * g) * H:(2 * g + 1) * H].set(wf[:, g * H:(g + 1) * H])
        out = out.at[in_f:, (2 * g + 1) * H:(2 * g + 2) * H].set(wr[:, g * H:(g + 1) * H])
    return out


def _stack_gi_bias(bif, bir, bhf, bhr, H):
    """(1, 6H) gi bias: b_ih (all gates) + b_hh folded in for r/z only (not n)."""
    parts = []
    for g in range(3):
        f = bif[:, g * H:(g + 1) * H]
        r = bir[:, g * H:(g + 1) * H]
        if g < 2:  # r, z: b_hh can be folded into gi
            f = f + bhf[:, g * H:(g + 1) * H]
            r = r + bhr[:, g * H:(g + 1) * H]
        parts += [f, r]
    return jnp.concatenate(parts, axis=1)


def prepack_params(params):
    H = params["gru_l0_fwd"]["whh_t"].shape[0]
    p0f, p0r = params["gru_l0_fwd"], params["gru_l0_rev"]
    p1f, p1r = params["gru_l1_fwd"], params["gru_l1_rev"]

    def pack_layer(pf, pr):
        return {
            "w": _interleave_gate_cols(pf["wih_t"], pr["wih_t"], H),
            "bi": _stack_gi_bias(pf["bih"], pr["bih"], pf["bhh"], pr["bhh"], H),
            "whh": _interleave_gate_cols(pf["whh_t"], pr["whh_t"], H),   # block-diag
            "bhn": jnp.concatenate([pf["bhh"][:, 2 * H:], pr["bhh"][:, 2 * H:]], axis=1),
        }

    l0, l1 = pack_layer(p0f, p0r), pack_layer(p1f, p1r)
    return {
        "w0": l0["w"], "bi0": l0["bi"], "whh0": l0["whh"], "bhn0": l0["bhn"],
        "w1": l1["w"], "bi1": l1["bi"], "whh1": l1["whh"], "bhn1": l1["bhn"],
        "wh1": params["w1_t"], "bh1": params["b1"],
        "wh2": params["w2_t"], "bh2": params["b2"],
    }


# ----------------------------------------------------------------------------
# Full forward pass: pad batch to sublane count, one fused pallas_call, unpad.
# ----------------------------------------------------------------------------
def e2eet_forward(packed, batch_x):
    B, T, E = batch_x.shape
    H = packed["whh0"].shape[0] // 2
    L = packed["wh2"].shape[0]
    Bp = max(8, ((B + 7) // 8) * 8)   # pad batch to f32 sublane multiple

    # pack_padded / pad_packed with all lengths == max_seq_len is a no-op.
    # TODO(synk): shorter-than-max sequences would need packed-sequence semantics.
    xp = jnp.zeros((Bp, T, E), jnp.float32).at[:B].set(batch_x)
    x_tb = jnp.transpose(xp, (1, 0, 2))                         # (T, Bp, E) time-major
    xx0 = jnp.concatenate([x_tb, x_tb[::-1]], axis=-1)          # [x(t) | x(T-1-t)]
    xx0 = xx0.reshape(T * Bp, 2 * E)

    kernel = functools.partial(fused_gru_head_kernel, T=T, Bp=Bp, H=H)
    y = pl.pallas_call(
        kernel,
        out_shape=jax.ShapeDtypeStruct((T * Bp, L), jnp.float32),
        scratch_shapes=[
            pltpu.VMEM((T * Bp, 4 * H), jnp.float32),   # layer-0 out (+ reversed copy)
            pltpu.VMEM((T * Bp, 2 * H), jnp.float32),   # layer-1 out
        ],
    )(
        xx0,
        packed["w0"], packed["bi0"], packed["whh0"], packed["bhn0"],
        packed["w1"], packed["bi1"], packed["whh1"], packed["bhn1"],
        packed["wh1"], packed["bh1"], packed["wh2"], packed["bh2"],
    )
    return jnp.transpose(y.reshape(T, Bp, L), (1, 0, 2))[:B]     # (B, T, label_size)


# ----------------------------------------------------------------------------
# Deterministic parameter init (PyTorch-style uniform(-1/sqrt(fan), 1/sqrt(fan))).
# ----------------------------------------------------------------------------
def init_params(key, embedding_dim, hidden_dim, label_size):
    params = {}

    def uni(key, shape, bound):
        return jax.random.uniform(key, shape, jnp.float32, -bound, bound)

    kg = 1.0 / jnp.sqrt(hidden_dim)
    for layer in range(2):
        in_dim = embedding_dim if layer == 0 else 2 * hidden_dim
        for tag in ("fwd", "rev"):
            key, k1, k2, k3, k4 = jax.random.split(key, 5)
            params[f"gru_l{layer}_{tag}"] = {
                "wih_t": uni(k1, (in_dim, 3 * hidden_dim), kg),
                "whh_t": uni(k2, (hidden_dim, 3 * hidden_dim), kg),
                "bih": uni(k3, (1, 3 * hidden_dim), kg),
                "bhh": uni(k4, (1, 3 * hidden_dim), kg),
            }

    key, k1, k2, k3, k4 = jax.random.split(key, 5)
    kl1 = 1.0 / jnp.sqrt(2 * hidden_dim)
    kl2 = 1.0 / jnp.sqrt(label_size)
    params["w1_t"] = uni(k1, (2 * hidden_dim, label_size), kl1)
    params["b1"] = uni(k2, (1, label_size), kl1)
    params["w2_t"] = uni(k3, (label_size, label_size), kl2)
    params["b2"] = uni(k4, (1, label_size), kl2)
    return params, key


# ----------------------------------------------------------------------------
# Pure-JAX reference (lax.scan, per-direction formulation) for correctness check.
# ----------------------------------------------------------------------------
def _gru_dir_ref(x_tbf, wih_t, whh_t, bih, bhh):
    H = whh_t.shape[0]

    def step(h, xt):
        gi = xt @ wih_t + bih[0]
        gh = h @ whh_t + bhh[0]
        r = jax.nn.sigmoid(gi[:, :H] + gh[:, :H])
        z = jax.nn.sigmoid(gi[:, H:2 * H] + gh[:, H:2 * H])
        n = jnp.tanh(gi[:, 2 * H:] + r * gh[:, 2 * H:])
        h_new = (1.0 - z) * n + z * h
        return h_new, h_new

    h0 = jnp.zeros((x_tbf.shape[1], H), jnp.float32)
    _, ys = jax.lax.scan(step, h0, x_tbf)
    return ys


def reference_forward(params, batch_x):
    B, T, _ = batch_x.shape
    layer_in = jnp.transpose(batch_x, (1, 0, 2))
    for layer in range(2):
        outs = []
        for tag, rev in (("fwd", False), ("rev", True)):
            p = params[f"gru_l{layer}_{tag}"]
            xin = jnp.flip(layer_in, axis=0) if rev else layer_in
            out = _gru_dir_ref(xin, p["wih_t"], p["whh_t"], p["bih"], p["bhh"])
            if rev:
                out = jnp.flip(out, axis=0)
            outs.append(out)
        layer_in = jnp.concatenate(outs, axis=-1)
    flat = jnp.transpose(layer_in, (1, 0, 2)).reshape(B * T, -1)
    h = jnp.maximum(flat @ params["w1_t"] + params["b1"][0], 0.0)
    y = h @ params["w2_t"] + params["b2"][0]
    return y.reshape(B, T, -1)


if __name__ == "__main__":
    batch_size, max_seq_len = 2, 8
    embedding_dim, hidden_dim, label_size = 32, 32, 16

    key = jax.random.PRNGKey(0)
    params, key = init_params(key, embedding_dim, hidden_dim, label_size)
    key, kx = jax.random.split(key)
    batch_x = jax.random.normal(kx, (batch_size, max_seq_len, embedding_dim), jnp.float32)

    packed = jax.tree_util.tree_map(jax.block_until_ready, prepack_params(params))

    fwd = jax.jit(e2eet_forward)
    y_hat = jax.block_until_ready(fwd(packed, batch_x))

    assert y_hat.shape == (batch_size, max_seq_len, label_size)
    y_ref = reference_forward(params, batch_x)
    assert jnp.allclose(y_hat, y_ref, atol=5e-4, rtol=5e-4)

    print("KERNEL_OK")
</pallas_src>

<mosaic_0001>
module attributes {stable_mosaic.version = 11 : i64} {
  func.func @fused_gru_head_kernel(%arg0: memref<64x64xf32, #tpu.memory_space<vmem>>, %arg1: memref<64x192xf32, #tpu.memory_space<vmem>>, %arg2: memref<1x192xf32, #tpu.memory_space<vmem>>, %arg3: memref<64x192xf32, #tpu.memory_space<vmem>>, %arg4: memref<1x64xf32, #tpu.memory_space<vmem>>, %arg5: memref<128x192xf32, #tpu.memory_space<vmem>>, %arg6: memref<1x192xf32, #tpu.memory_space<vmem>>, %arg7: memref<64x192xf32, #tpu.memory_space<vmem>>, %arg8: memref<1x64xf32, #tpu.memory_space<vmem>>, %arg9: memref<64x16xf32, #tpu.memory_space<vmem>>, %arg10: memref<1x16xf32, #tpu.memory_space<vmem>>, %arg11: memref<16x16xf32, #tpu.memory_space<vmem>>, %arg12: memref<1x16xf32, #tpu.memory_space<vmem>>, %arg13: memref<64x16xf32, #tpu.memory_space<vmem>>, %arg14: memref<64x128xf32, #tpu.memory_space<vmem>>, %arg15: memref<64x64xf32, #tpu.memory_space<vmem>>) attributes {dimension_semantics = [], scalar_prefetch = 0 : i64, scratch_operands = 2 : i64, tpu.core_type = #tpu.core_type<tc>} {
    %c0 = arith.constant 0 : index
    %c0_0 = arith.constant 0 : index
    %0 = vector.load %arg0[%c0, %c0_0] : memref<64x64xf32, #tpu.memory_space<vmem>>, vector<64x64xf32>
    %c0_1 = arith.constant 0 : index
    %c0_2 = arith.constant 0 : index
    %1 = vector.load %arg1[%c0_1, %c0_2] : memref<64x192xf32, #tpu.memory_space<vmem>>, vector<64x192xf32>
    %cst = arith.constant dense<0.000000e+00> : vector<64x192xf32>
    %2 = tpu.matmul %0, %1, %cst {dimension_numbers = #tpu.dot_dimension_numbers<[1], [0], [0], [1], [0, 0, 1, 1], [], []>} : vector<64x64xf32>, vector<64x192xf32>, vector<64x192xf32> -> vector<64x192xf32>
    %c0_3 = arith.constant 0 : index
    %c0_4 = arith.constant 0 : index
    %3 = vector.load %arg2[%c0_3, %c0_4] : memref<1x192xf32, #tpu.memory_space<vmem>>, vector<1x192xf32>
    %4 = vector.broadcast %3 : vector<1x192xf32> to vector<64x192xf32>
    %5 = arith.addf %2, %4 : vector<64x192xf32>
    %c0_5 = arith.constant 0 : index
    %c0_6 = arith.constant 0 : index
    %6 = vector.load %arg3[%c0_5, %c0_6] : memref<64x192xf32, #tpu.memory_space<vmem>>, vector<64x192xf32>
    %c0_7 = arith.constant 0 : index
    %c0_8 = arith.constant 0 : index
    %7 = vector.load %arg4[%c0_7, %c0_8] : memref<1x64xf32, #tpu.memory_space<vmem>>, vector<1x64xf32>
    %8 = vector.shape_cast %7 : vector<1x64xf32> to vector<1x64xf32>
    %9 = vector.broadcast %8 : vector<1x64xf32> to vector<8x64xf32>
    %cst_9 = arith.constant 0.000000e+00 : f32
    %10 = vector.broadcast %cst_9 : f32 to vector<8x64xf32>
    %cst_10 = arith.constant dense<0.000000e+00> : vector<8x192xf32>
    %11 = tpu.matmul %10, %6, %cst_10 {dimension_numbers = #tpu.dot_dimension_numbers<[1], [0], [0], [1], [0, 0, 1, 1], [], []>} : vector<8x64xf32>, vector<64x192xf32>, vector<8x192xf32> -> vector<8x192xf32>
    %12 = vector.extract_strided_slice %5 {offsets = [0, 0], sizes = [8, 192], strides = [1, 1]} : vector<64x192xf32> to vector<8x192xf32>
    %13 = vector.extract_strided_slice %12 {offsets = [0, 0], sizes = [8, 64], strides = [1, 1]} : vector<8x192xf32> to vector<8x64xf32>
    %14 = vector.extract_strided_slice %11 {offsets = [0, 0], sizes = [8, 64], strides = [1, 1]} : vector<8x192xf32> to vector<8x64xf32>
    %15 = arith.addf %13, %14 : vector<8x64xf32>
    %16 = arith.negf %15 : vector<8x64xf32>
    %17 = math.exp %16 : vector<8x64xf32>
    %cst_11 = arith.constant 1.000000e+00 : f32
    %18 = vector.broadcast %cst_11 : f32 to vector<8x64xf32>
    %19 = arith.addf %18, %17 : vector<8x64xf32>
    %20 = arith.divf %18, %19 : vector<8x64xf32>
    %21 = vector.extract_strided_slice %12 {offsets = [0, 64], sizes = [8, 64], strides = [1, 1]} : vector<8x192xf32> to vector<8x64xf32>
    %22 = vector.extract_strided_slice %11 {offsets = [0, 64], sizes = [8, 64], strides = [1, 1]} : vector<8x192xf32> to vector<8x64xf32>
    %23 = arith.addf %21, %22 : vector<8x64xf32>
    %24 = arith.negf %23 : vector<8x64xf32>
    %25 = math.exp %24 : vector<8x64xf32>
    %cst_12 = arith.constant 1.000000e+00 : f32
    %26 = vector.broadcast %cst_12 : f32 to vector<8x64xf32>
    %27 = arith.addf %26, %25 : vector<8x64xf32>
    %28 = arith.divf %26, %27 : vector<8x64xf32>
    %29 = vector.extract_strided_slice %12 {offsets = [0, 128], sizes = [8, 64], strides = [1, 1]} : vector<8x192xf32> to vector<8x64xf32>
    %30 = vector.extract_strided_slice %11 {offsets = [0, 128], sizes = [8, 64], strides = [1, 1]} : vector<8x192xf32> to vector<8x64xf32>
    %31 = arith.addf %30, %9 : vector<8x64xf32>
    %32 = arith.mulf %20, %31 : vector<8x64xf32>
    %33 = arith.addf %29, %32 : vector<8x64xf32>
    %34 = math.tanh %33 : vector<8x64xf32>
    %35 = arith.subf %10, %34 : vector<8x64xf32>
    %36 = arith.mulf %28, %35 : vector<8x64xf32>
    %37 = arith.addf %34, %36 : vector<8x64xf32>
    %38 = vector.extract_strided_slice %37 {offsets = [0, 0], sizes = [8, 32], strides = [1, 1]} : vector<8x64xf32> to vector<8x32xf32>
    %39 = vector.extract_strided_slice %37 {offsets = [0, 32], sizes = [8, 32], strides = [1, 1]} : vector<8x64xf32> to vector<8x32xf32>
    %c0_13 = arith.constant 0 : index
    %c0_14 = arith.constant 0 : index
    %40 = vector.load %arg14[%c0_13, %c0_14] : memref<64x128xf32, #tpu.memory_space<vmem>>, vector<8x32xf32>
    tpu.vector_store %arg14[%c0_13, %c0_14], %38 {strides = array<i32>} : memref<64x128xf32, #tpu.memory_space<vmem>>, vector<8x32xf32>,
    %c56 = arith.constant 56 : index
    %c32 = arith.constant 32 : index
    %41 = vector.load %arg14[%c56, %c32] : memref<64x128xf32, #tpu.memory_space<vmem>>, vector<8x32xf32>
    tpu.vector_store %arg14[%c56, %c32], %39 {strides = array<i32>} : memref<64x128xf32, #tpu.memory_space<vmem>>, vector<8x32xf32>,
    %c56_15 = arith.constant 56 : index
    %c64 = arith.constant 64 : index
    %42 = vector.load %arg14[%c56_15, %c64] : memref<64x128xf32, #tpu.memory_space<vmem>>, vector<8x32xf32>
    tpu.vector_store %arg14[%c56_15, %c64], %38 {strides = array<i32>} : memref<64x128xf32, #tpu.memory_space<vmem>>, vector<8x32xf32>,
    %c0_16 = arith.constant 0 : index
    %c96 = arith.constant 96 : index
    %43 = vector.load %arg14[%c0_16, %c96] : memref<64x128xf32, #tpu.memory_space<vmem>>, vector<8x32xf32>
    tpu.vector_store %arg14[%c0_16, %c96], %39 {strides = array<i32>} : memref<64x128xf32, #tpu.memory_space<vmem>>, vector<8x32xf32>,
    %cst_17 = arith.constant dense<0.000000e+00> : vector<8x192xf32>
    %44 = tpu.matmul %37, %6, %cst_17 {dimension_numbers = #tpu.dot_dimension_numbers<[1], [0], [0], [1], [0, 0, 1, 1], [], []>} : vector<8x64xf32>, vector<64x192xf32>, vector<8x192xf32> -> vector<8x192xf32>
    %45 = vector.extract_strided_slice %5 {offsets = [8, 0], sizes = [8, 192], strides = [1, 1]} : vector<64x192xf32> to vector<8x192xf32>
    %46 = vector.extract_strided_slice %45 {offsets = [0, 0], sizes = [8, 64], strides = [1, 1]} : vector<8x192xf32> to vector<8x64xf32>
    %47 = vector.extract_strided_slice %44 {offsets = [0, 0], sizes = [8, 64], strides = [1, 1]} : vector<8x192xf32> to vector<8x64xf32>
    %48 = arith.addf %46, %47 : vector<8x64xf32>
    %49 = arith.negf %48 : vector<8x64xf32>
    %50 = math.exp %49 : vector<8x64xf32>
    %cst_18 = arith.constant 1.000000e+00 : f32
    %51 = vector.broadcast %cst_18 : f32 to vector<8x64xf32>
    %52 = arith.addf %51, %50 : vector<8x64xf32>
    %53 = arith.divf %51, %52 : vector<8x64xf32>
    %54 = vector.extract_strided_slice %45 {offsets = [0, 64], sizes = [8, 64], strides = [1, 1]} : vector<8x192xf32> to vector<8x64xf32>
    %55 = vector.extract_strided_slice %44 {offsets = [0, 64], sizes = [8, 64], strides = [1, 1]} : vector<8x192xf32> to vector<8x64xf32>
    %56 = arith.addf %54, %55 : vector<8x64xf32>
    %57 = arith.negf %56 : vector<8x64xf32>
    %58 = math.exp %57 : vector<8x64xf32>
    %cst_19 = arith.constant 1.000000e+00 : f32
    %59 = vector.broadcast %cst_19 : f32 to vector<8x64xf32>
    %60 = arith.addf %59, %58 : vector<8x64xf32>
    %61 = arith.divf %59, %60 : vector<8x64xf32>
    %62 = vector.extract_strided_slice %45 {offsets = [0, 128], sizes = [8, 64], strides = [1, 1]} : vector<8x192xf32> to vector<8x64xf32>
    %63 = vector.extract_strided_slice %44 {offsets = [0, 128], sizes = [8, 64], strides = [1, 1]} : vector<8x192xf32> to vector<8x64xf32>
    %64 = arith.addf %63, %9 : vector<8x64xf32>
    %65 = arith.mulf %53, %64 : vector<8x64xf32>
    %66 = arith.addf %62, %65 : vector<8x64xf32>
    %67 = math.tanh %66 : vector<8x64xf32>
    %68 = arith.subf %37, %67 : vector<8x64xf32>
    %69 = arith.mulf %61, %68 : vector<8x64xf32>
    %70 = arith.addf %67, %69 : vector<8x64xf32>
    %71 = vector.extract_strided_slice %70 {offsets = [0, 0], sizes = [8, 32], strides = [1, 1]} : vector<8x64xf32> to vector<8x32xf32>
    %72 = vector.extract_strided_slice %70 {offsets = [0, 32], sizes = [8, 32], strides = [1, 1]} : vector<8x64xf32> to vector<8x32xf32>
    %c8 = arith.constant 8 : index
    %c0_20 = arith.constant 0 : index
    %73 = vector.load %arg14[%c8, %c0_20] : memref<64x128xf32, #tpu.memory_space<vmem>>, vector<8x32xf32>
    tpu.vector_store %arg14[%c8, %c0_20], %71 {strides = array<i32>} : memref<64x128xf32, #tpu.memory_space<vmem>>, vector<8x32xf32>,
    %c48 = arith.constant 48 : index
    %c32_21 = arith.constant 32 : index
    %74 = vector.load %arg14[%c48, %c32_21] : memref<64x128xf32, #tpu.memory_space<vmem>>, vector<8x32xf32>
    tpu.vector_store %arg14[%c48, %c32_21], %72 {strides = array<i32>} : memref<64x128xf32, #tpu.memory_space<vmem>>, vector<8x32xf32>,
    %c48_22 = arith.constant 48 : index
    %c64_23 = arith.constant 64 : index
    %75 = vector.load %arg14[%c48_22, %c64_23] : memref<64x128xf32, #tpu.memory_space<vmem>>, vector<8x32xf32>
    tpu.vector_store %arg14[%c48_22, %c64_23], %71 {strides = array<i32>} : memref<64x128xf32, #tpu.memory_space<vmem>>, vector<8x32xf32>,
    %c8_24 = arith.constant 8 : index
    %c96_25 = arith.constant 96 : index
    %76 = vector.load %arg14[%c8_24, %c96_25] : memref<64x128xf32, #tpu.memory_space<vmem>>, vector<8x32xf32>
    tpu.vector_store %arg14[%c8_24, %c96_25], %72 {strides = array<i32>} : memref<64x128xf32, #tpu.memory_space<vmem>>, vector<8x32xf32>,
    %cst_26 = arith.constant dense<0.000000e+00> : vector<8x192xf32>
    %77 = tpu.matmul %70, %6, %cst_26 {dimension_numbers = #tpu.dot_dimension_numbers<[1], [0], [0], [1], [0, 0, 1, 1], [], []>} : vector<8x64xf32>, vector<64x192xf32>, vector<8x192xf32> -> vector<8x192xf32>
    %78 = vector.extract_strided_slice %5 {offsets = [16, 0], sizes = [8, 192], strides = [1, 1]} : vector<64x192xf32> to vector<8x192xf32>
    %79 = vector.extract_strided_slice %78 {offsets = [0, 0], sizes = [8, 64], strides = [1, 1]} : vector<8x192xf32> to vector<8x64xf32>
    %80 = vector.extract_strided_slice %77 {offsets = [0, 0], sizes = [8, 64], strides = [1, 1]} : vector<8x192xf32> to vector<8x64xf32>
    %81 = arith.addf %79, %80 : vector<8x64xf32>
    %82 = arith.negf %81 : vector<8x64xf32>
    %83 = math.exp %82 : vector<8x64xf32>
    %cst_27 = arith.constant 1.000000e+00 : f32
    %84 = vector.broadcast %cst_27 : f32 to vector<8x64xf32>
    %85 = arith.addf %84, %83 : vector<8x64xf32>
    %86 = arith.divf %84, %85 : vector<8x64xf32>
    %87 = vector.extract_strided_slice %78 {offsets = [0, 64], sizes = [8, 64], strides = [1, 1]} : vector<8x192xf32> to vector<8x64xf32>
    %88 = vector.extract_strided_slice %77 {offsets = [0, 64], sizes = [8, 64], strides = [1, 1]} : vector<8x192xf32> to vector<8x64xf32>
    %89 = arith.addf %87, %88 : vector<8x64xf32>
    %90 = arith.negf %89 : vector<8x64xf32>
    %91 = math.exp %90 : vector<8x64xf32>
    %cst_28 = arith.constant 1.000000e+00 : f32
    %92 = vector.broadcast %cst_28 : f32 to vector<8x64xf32>
    %93 = arith.addf %92, %91 : vector<8x64xf32>
    %94 = arith.divf %92, %93 : vector<8x64xf32>
    %95 = vector.extract_strided_slice %78 {offsets = [0, 128], sizes = [8, 64], strides = [1, 1]} : vector<8x192xf32> to vector<8x64xf32>
    %96 = vector.extract_strided_slice %77 {offsets = [0, 128], sizes = [8, 64], strides = [1, 1]} : vector<8x192xf32> to vector<8x64xf32>
    %97 = arith.addf %96, %9 : vector<8x64xf32>
    %98 = arith.mulf %86, %97 : vector<8x64xf32>
    %99 = arith.addf %95, %98 : vector<8x64xf32>
    %100 = math.tanh %99 : vector<8x64xf32>
    %101 = arith.subf %70, %100 : vector<8x64xf32>
    %102 = arith.mulf %94, %101 : vector<8x64xf32>
    %103 = arith.addf %100, %102 : vector<8x64xf32>
    %104 = vector.extract_strided_slice %103 {offsets = [0, 0], sizes = [8, 32], strides = [1, 1]} : vector<8x64xf32> to vector<8x32xf32>
    %105 = vector.extract_strided_slice %103 {offsets = [0, 32], sizes = [8, 32], strides = [1, 1]} : vector<8x64xf32> to vector<8x32xf32>
    %c16 = arith.constant 16 : index
    %c0_29 = arith.constant 0 : index
    %106 = vector.load %arg14[%c16, %c0_29] : memref<64x128xf32, #tpu.memory_space<vmem>>, vector<8x32xf32>
    tpu.vector_store %arg14[%c16, %c0_29], %104 {strides = array<i32>} : memref<64x128xf32, #tpu.memory_space<vmem>>, vector<8x32xf32>,
    %c40 = arith.constant 40 : index
    %c32_30 = arith.constant 32 : index
    %107 = vector.load %arg14[%c40, %c32_30] : memref<64x128xf32, #tpu.memory_space<vmem>>, vector<8x32xf32>
    tpu.vector_store %arg14[%c40, %c32_30], %105 {strides = array<i32>} : memref<64x128xf32, #tpu.memory_space<vmem>>, vector<8x32xf32>,
    %c40_31 = arith.constant 40 : index
    %c64_32 = arith.constant 64 : index
    %108 = vector.load %arg14[%c40_31, %c64_32] : memref<64x128xf32, #tpu.memory_space<vmem>>, vector<8x32xf32>
    tpu.vector_store %arg14[%c40_31, %c64_32], %104 {strides = array<i32>} : memref<64x128xf32, #tpu.memory_space<vmem>>, vector<8x32xf32>,
    %c16_33 = arith.constant 16 : index
    %c96_34 = arith.constant 96 : index
    %109 = vector.load %arg14[%c16_33, %c96_34] : memref<64x128xf32, #tpu.memory_space<vmem>>, vector<8x32xf32>
    tpu.vector_store %arg14[%c16_33, %c96_34], %105 {strides = array<i32>} : memref<64x128xf32, #tpu.memory_space<vmem>>, vector<8x32xf32>,
    %cst_35 = arith.constant dense<0.000000e+00> : vector<8x192xf32>
    %110 = tpu.matmul %103, %6, %cst_35 {dimension_numbers = #tpu.dot_dimension_numbers<[1], [0], [0], [1], [0, 0, 1, 1], [], []>} : vector<8x64xf32>, vector<64x192xf32>, vector<8x192xf32> -> vector<8x192xf32>
    %111 = vector.extract_strided_slice %5 {offsets = [24, 0], sizes = [8, 192], strides = [1, 1]} : vector<64x192xf32> to vector<8x192xf32>
    %112 = vector.extract_strided_slice %111 {offsets = [0, 0], sizes = [8, 64], strides = [1, 1]} : vector<8x192xf32> to vector<8x64xf32>
    %113 = vector.extract_strided_slice %110 {offsets = [0, 0], sizes = [8, 64], strides = [1, 1]} : vector<8x192xf32> to vector<8x64xf32>
    %114 = arith.addf %112, %113 : vector<8x64xf32>
    %115 = arith.negf %114 : vector<8x64xf32>
    %116 = math.exp %115 : vector<8x64xf32>
    %cst_36 = arith.constant 1.000000e+00 : f32
    %117 = vector.broadcast %cst_36 : f32 to vector<8x64xf32>
    %118 = arith.addf %117, %116 : vector<8x64xf32>
    %119 = arith.divf %117, %118 : vector<8x64xf32>
    %120 = vector.extract_strided_slice %111 {offsets = [0, 64], sizes = [8, 64], strides = [1, 1]} : vector<8x192xf32> to vector<8x64xf32>
    %121 = vector.extract_strided_slice %110 {offsets = [0, 64], sizes = [8, 64], strides = [1, 1]} : vector<8x192xf32> to vector<8x64xf32>
    %122 = arith.addf %120, %121 : vector<8x64xf32>
    %123 = arith.negf %122 : vector<8x64xf32>
    %124 = math.exp %123 : vector<8x64xf32>
    %cst_37 = arith.constant 1.000000e+00 : f32
    %125 = vector.broadcast %cst_37 : f32 to vector<8x64xf32>
    %126 = arith.addf %125, %124 : vector<8x64xf32>
    %127 = arith.divf %125, %126 : vector<8x64xf32>
    %128 = vector.extract_strided_slice %111 {offsets = [0, 128], sizes = [8, 64], strides = [1, 1]} : vector<8x192xf32> to vector<8x64xf32>
    %129 = vector.extract_strided_slice %110 {offsets = [0, 128], sizes = [8, 64], strides = [1, 1]} : vector<8x192xf32> to vector<8x64xf32>
    %130 = arith.addf %129, %9 : vector<8x64xf32>
    %131 = arith.mulf %119, %130 : vector<8x64xf32>
    %132 = arith.addf %128, %131 : vector<8x64xf32>
    %133 = math.tanh %132 : vector<8x64xf32>
    %134 = arith.subf %103, %133 : vector<8x64xf32>
    %135 = arith.mulf %127, %134 : vector<8x64xf32>
    %136 = arith.addf %133, %135 : vector<8x64xf32>
    %137 = vector.extract_strided_slice %136 {offsets = [0, 0], sizes = [8, 32], strides = [1, 1]} : vector<8x64xf32> to vector<8x32xf32>
    %138 = vector.extract_strided_slice %136 {offsets = [0, 32], sizes = [8, 32], strides = [1, 1]} : vector<8x64xf32> to vector<8x32xf32>
    %c24 = arith.constant 24 : index
    %c0_38 = arith.constant 0 : index
    %139 = vector.load %arg14[%c24, %c0_38] : memref<64x128xf32, #tpu.memory_space<vmem>>, vector<8x32xf32>
    tpu.vector_store %arg14[%c24, %c0_38], %137 {strides = array<i32>} : memref<64x128xf32, #tpu.memory_space<vmem>>, vector<8x32xf32>,
    %c32_39 = arith.constant 32 : index
    %c32_40 = arith.constant 32 : index
    %140 = vector.load %arg14[%c32_39, %c32_40] : memref<64x128xf32, #tpu.memory_space<vmem>>, vector<8x32xf32>
    tpu.vector_store %arg14[%c32_39, %c32_40], %138 {strides = array<i32>} : memref<64x128xf32, #tpu.memory_space<vmem>>, vector<8x32xf32>,
    %c32_41 = arith.constant 32 : index
    %c64_42 = arith.constant 64 : index
    %141 = vector.load %arg14[%c32_41, %c64_42] : memref<64x128xf32, #tpu.memory_space<vmem>>, vector<8x32xf32>
    tpu.vector_store %arg14[%c32_41, %c64_42], %137 {strides = array<i32>} : memref<64x128xf32, #tpu.memory_space<vmem>>, vector<8x32xf32>,
    %c24_43 = arith.constant 24 : index
    %c96_44 = arith.constant 96 : index
    %142 = vector.load %arg14[%c24_43, %c96_44] : memref<64x128xf32, #tpu.memory_space<vmem>>, vector<8x32xf32>
    tpu.vector_store %arg14[%c24_43, %c96_44], %138 {strides = array<i32>} : memref<64x128xf32, #tpu.memory_space<vmem>>, vector<8x32xf32>,
    %cst_45 = arith.constant dense<0.000000e+00> : vector<8x192xf32>
    %143 = tpu.matmul %136, %6, %cst_45 {dimension_numbers = #tpu.dot_dimension_numbers<[1], [0], [0], [1], [0, 0, 1, 1], [], []>} : vector<8x64xf32>, vector<64x192xf32>, vector<8x192xf32> -> vector<8x192xf32>
    %144 = vector.extract_strided_slice %5 {offsets = [32, 0], sizes = [8, 192], strides = [1, 1]} : vector<64x192xf32> to vector<8x192xf32>
    %145 = vector.extract_strided_slice %144 {offsets = [0, 0], sizes = [8, 64], strides = [1, 1]} : vector<8x192xf32> to vector<8x64xf32>
    %146 = vector.extract_strided_slice %143 {offsets = [0, 0], sizes = [8, 64], strides = [1, 1]} : vector<8x192xf32> to vector<8x64xf32>
    %147 = arith.addf %145, %146 : vector<8x64xf32>
    %148 = arith.negf %147 : vector<8x64xf32>
    %149 = math.exp %148 : vector<8x64xf32>
    %cst_46 = arith.constant 1.000000e+00 : f32
    %150 = vector.broadcast %cst_46 : f32 to vector<8x64xf32>
    %151 = arith.addf %150, %149 : vector<8x64xf32>
    %152 = arith.divf %150, %151 : vector<8x64xf32>
    %153 = vector.extract_strided_slice %144 {offsets = [0, 64], sizes = [8, 64], strides = [1, 1]} : vector<8x192xf32> to vector<8x64xf32>
    %154 = vector.extract_strided_slice %143 {offsets = [0, 64], sizes = [8, 64], strides = [1, 1]} : vector<8x192xf32> to vector<8x64xf32>
    %155 = arith.addf %153, %154 : vector<8x64xf32>
    %156 = arith.negf %155 : vector<8x64xf32>
    %157 = math.exp %156 : vector<8x64xf32>
    %cst_47 = arith.constant 1.000000e+00 : f32
    %158 = vector.broadcast %cst_47 : f32 to vector<8x64xf32>
    %159 = arith.addf %158, %157 : vector<8x64xf32>
    %160 = arith.divf %158, %159 : vector<8x64xf32>
    %161 = vector.extract_strided_slice %144 {offsets = [0, 128], sizes = [8, 64], strides = [1, 1]} : vector<8x192xf32> to vector<8x64xf32>
    %162 = vector.extract_strided_slice %143 {offsets = [0, 128], sizes = [8, 64], strides = [1, 1]} : vector<8x192xf32> to vector<8x64xf32>
    %163 = arith.addf %162, %9 : vector<8x64xf32>
    %164 = arith.mulf %152, %163 : vector<8x64xf32>
    %165 = arith.addf %161, %164 : vector<8x64xf32>
    %166 = math.tanh %165 : vector<8x64xf32>
    %167 = arith.subf %136, %166 : vector<8x64xf32>
    %168 = arith.mulf %160, %167 : vector<8x64xf32>
    %169 = arith.addf %166, %168 : vector<8x64xf32>
    %170 = vector.extract_strided_slice %169 {offsets = [0, 0], sizes = [8, 32], strides = [1, 1]} : vector<8x64xf32> to vector<8x32xf32>
    %171 = vector.extract_strided_slice %169 {offsets = [0, 32], sizes = [8, 32], strides = [1, 1]} : vector<8x64xf32> to vector<8x32xf32>
    %c32_48 = arith.constant 32 : index
    %c0_49 = arith.constant 0 : index
    %172 = vector.load %arg14[%c32_48, %c0_49] : memref<64x128xf32, #tpu.memory_space<vmem>>, vector<8x32xf32>
    tpu.vector_store %arg14[%c32_48, %c0_49], %170 {strides = array<i32>} : memref<64x128xf32, #tpu.memory_space<vmem>>, vector<8x32xf32>,
    %c24_50 = arith.constant 24 : index
    %c32_51 = arith.constant 32 : index
    %173 = vector.load %arg14[%c24_50, %c32_51] : memref<64x128xf32, #tpu.memory_space<vmem>>, vector<8x32xf32>
    tpu.vector_store %arg14[%c24_50, %c32_51], %171 {strides = array<i32>} : memref<64x128xf32, #tpu.memory_space<vmem>>, vector<8x32xf32>,
    %c24_52 = arith.constant 24 : index
    %c64_53 = arith.constant 64 : index
    %174 = vector.load %arg14[%c24_52, %c64_53] : memref<64x128xf32, #tpu.memory_space<vmem>>, vector<8x32xf32>
    tpu.vector_store %arg14[%c24_52, %c64_53], %170 {strides = array<i32>} : memref<64x128xf32, #tpu.memory_space<vmem>>, vector<8x32xf32>,
    %c32_54 = arith.constant 32 : index
    %c96_55 = arith.constant 96 : index
    %175 = vector.load %arg14[%c32_54, %c96_55] : memref<64x128xf32, #tpu.memory_space<vmem>>, vector<8x32xf32>
    tpu.vector_store %arg14[%c32_54, %c96_55], %171 {strides = array<i32>} : memref<64x128xf32, #tpu.memory_space<vmem>>, vector<8x32xf32>,
    %cst_56 = arith.constant dense<0.000000e+00> : vector<8x192xf32>
    %176 = tpu.matmul %169, %6, %cst_56 {dimension_numbers = #tpu.dot_dimension_numbers<[1], [0], [0], [1], [0, 0, 1, 1], [], []>} : vector<8x64xf32>, vector<64x192xf32>, vector<8x192xf32> -> vector<8x192xf32>
    %177 = vector.extract_strided_slice %5 {offsets = [40, 0], sizes = [8, 192], strides = [1, 1]} : vector<64x192xf32> to vector<8x192xf32>
    %178 = vector.extract_strided_slice %177 {offsets = [0, 0], sizes = [8, 64], strides = [1, 1]} : vector<8x192xf32> to vector<8x64xf32>
    %179 = vector.extract_strided_slice %176 {offsets = [0, 0], sizes = [8, 64], strides = [1, 1]} : vector<8x192xf32> to vector<8x64xf32>
    %180 = arith.addf %178, %179 : vector<8x64xf32>
    %181 = arith.negf %180 : vector<8x64xf32>
    %182 = math.exp %181 : vector<8x64xf32>
    %cst_57 = arith.constant 1.000000e+00 : f32
    %183 = vector.broadcast %cst_57 : f32 to vector<8x64xf32>
    %184 = arith.addf %183, %182 : vector<8x64xf32>
    %185 = arith.divf %183, %184 : vector<8x64xf32>
    %186 = vector.extract_strided_slice %177 {offsets = [0, 64], sizes = [8, 64], strides = [1, 1]} : vector<8x192xf32> to vector<8x64xf32>
    %187 = vector.extract_strided_slice %176 {offsets = [0, 64], sizes = [8, 64], strides = [1, 1]} : vector<8x192xf32> to vector<8x64xf32>
    %188 = arith.addf %186, %187 : vector<8x64xf32>
    %189 = arith.negf %188 : vector<8x64xf32>
    %190 = math.exp %189 : vector<8x64xf32>
    %cst_58 = arith.constant 1.000000e+00 : f32
    %191 = vector.broadcast %cst_58 : f32 to vector<8x64xf32>
    %192 = arith.addf %191, %190 : vector<8x64xf32>
    %193 = arith.divf %191, %192 : vector<8x64xf32>
    %194 = vector.extract_strided_slice %177 {offsets = [0, 128], sizes = [8, 64], strides = [1, 1]} : vector<8x192xf32> to vector<8x64xf32>
    %195 = vector.extract_strided_slice %176 {offsets = [0, 128], sizes = [8, 64], strides = [1, 1]} : vector<8x192xf32> to vector<8x64xf32>
    %196 = arith.addf %195, %9 : vector<8x64xf32>
    %197 = arith.mulf %185, %196 : vector<8x64xf32>
    %198 = arith.addf %194, %197 : vector<8x64xf32>
    %199 = math.tanh %198 : vector<8x64xf32>
    %200 = arith.subf %169, %199 : vector<8x64xf32>
    %201 = arith.mulf %193, %200 : vector<8x64xf32>
    %202 = arith.addf %199, %201 : vector<8x64xf32>
    %203 = vector.extract_strided_slice %202 {offsets = [0, 0], sizes = [8, 32], strides = [1, 1]} : vector<8x64xf32> to vector<8x32xf32>
    %204 = vector.extract_strided_slice %202 {offsets = [0, 32], sizes = [8, 32], strides = [1, 1]} : vector<8x64xf32> to vector<8x32xf32>
    %c40_59 = arith.constant 40 : index
    %c0_60 = arith.constant 0 : index
    %205 = vector.load %arg14[%c40_59, %c0_60] : memref<64x128xf32, #tpu.memory_space<vmem>>, vector<8x32xf32>
    tpu.vector_store %arg14[%c40_59, %c0_60], %203 {strides = array<i32>} : memref<64x128xf32, #tpu.memory_space<vmem>>, vector<8x32xf32>,
    %c16_61 = arith.constant 16 : index
    %c32_62 = arith.constant 32 : index
    %206 = vector.load %arg14[%c16_61, %c32_62] : memref<64x128xf32, #tpu.memory_space<vmem>>, vector<8x32xf32>
    tpu.vector_store %arg14[%c16_61, %c32_62], %204 {strides = array<i32>} : memref<64x128xf32, #tpu.memory_space<vmem>>, vector<8x32xf32>,
    %c16_63 = arith.constant 16 : index
    %c64_64 = arith.constant 64 : index
    %207 = vector.load %arg14[%c16_63, %c64_64] : memref<64x128xf32, #tpu.memory_space<vmem>>, vector<8x32xf32>
    tpu.vector_store %arg14[%c16_63, %c64_64], %203 {strides = array<i32>} : memref<64x128xf32, #tpu.memory_space<vmem>>, vector<8x32xf32>,
    %c40_65 = arith.constant 40 : index
    %c96_66 = arith.constant 96 : index
    %208 = vector.load %arg14[%c40_65, %c96_66] : memref<64x128xf32, #tpu.memory_space<vmem>>, vector<8x32xf32>
    tpu.vector_store %arg14[%c40_65, %c96_66], %204 {strides = array<i32>} : memref<64x128xf32, #tpu.memory_space<vmem>>, vector<8x32xf32>,
    %cst_67 = arith.constant dense<0.000000e+00> : vector<8x192xf32>
    %209 = tpu.matmul %202, %6, %cst_67 {dimension_numbers = #tpu.dot_dimension_numbers<[1], [0], [0], [1], [0, 0, 1, 1], [], []>} : vector<8x64xf32>, vector<64x192xf32>, vector<8x192xf32> -> vector<8x192xf32>
    %210 = vector.extract_strided_slice %5 {offsets = [48, 0], sizes = [8, 192], strides = [1, 1]} : vector<64x192xf32> to vector<8x192xf32>
    %211 = vector.extract_strided_slice %210 {offsets = [0, 0], sizes = [8, 64], strides = [1, 1]} : vector<8x192xf32> to vector<8x64xf32>
    %212 = vector.extract_strided_slice %209 {offsets = [0, 0], sizes = [8, 64], strides = [1, 1]} : vector<8x192xf32> to vector<8x64xf32>
    %213 = arith.addf %211, %212 : vector<8x64xf32>
    %214 = arith.negf %213 : vector<8x64xf32>
    %215 = math.exp %214 : vector<8x64xf32>
    %cst_68 = arith.constant 1.000000e+00 : f32
    %216 = vector.broadcast %cst_68 : f32 to vector<8x64xf32>
    %217 = arith.addf %216, %215 : vector<8x64xf32>
    %218 = arith.divf %216, %217 : vector<8x64xf32>
    %219 = vector.extract_strided_slice %210 {offsets = [0, 64], sizes = [8, 64], strides = [1, 1]} : vector<8x192xf32> to vector<8x64xf32>
    %220 = vector.extract_strided_slice %209 {offsets = [0, 64], sizes = [8, 64], strides = [1, 1]} : vector<8x192xf32> to vector<8x64xf32>
    %221 = arith.addf %219, %220 : vector<8x64xf32>
    %222 = arith.negf %221 : vector<8x64xf32>
    %223 = math.exp %222 : vector<8x64xf32>
    %cst_69 = arith.constant 1.000000e+00 : f32
    %224 = vector.broadcast %cst_69 : f32 to vector<8x64xf32>
    %225 = arith.addf %224, %223 : vector<8x64xf32>
    %226 = arith.divf %224, %225 : vector<8x64xf32>
    %227 = vector.extract_strided_slice %210 {offsets = [0, 128], sizes = [8, 64], strides = [1, 1]} : vector<8x192xf32> to vector<8x64xf32>
    %228 = vector.extract_strided_slice %209 {offsets = [0, 128], sizes = [8, 64], strides = [1, 1]} : vector<8x192xf32> to vector<8x64xf32>
    %229 = arith.addf %228, %9 : vector<8x64xf32>
    %230 = arith.mulf %218, %229 : vector<8x64xf32>
    %231 = arith.addf %227, %230 : vector<8x64xf32>
    %232 = math.tanh %231 : vector<8x64xf32>
    %233 = arith.subf %202, %232 : vector<8x64xf32>
    %234 = arith.mulf %226, %233 : vector<8x64xf32>
    %235 = arith.addf %232, %234 : vector<8x64xf32>
    %236 = vector.extract_strided_slice %235 {offsets = [0, 0], sizes = [8, 32], strides = [1, 1]} : vector<8x64xf32> to vector<8x32xf32>
    %237 = vector.extract_strided_slice %235 {offsets = [0, 32], sizes = [8, 32], strides = [1, 1]} : vector<8x64xf32> to vector<8x32xf32>
    %c48_70 = arith.constant 48 : index
    %c0_71 = arith.constant 0 : index
    %238 = vector.load %arg14[%c48_70, %c0_71] : memref<64x128xf32, #tpu.memory_space<vmem>>, vector<8x32xf32>
    tpu.vector_store %arg14[%c48_70, %c0_71], %236 {strides = array<i32>} : memref<64x128xf32, #tpu.memory_space<vmem>>, vector<8x32xf32>,
    %c8_72 = arith.constant 8 : index
    %c32_73 = arith.constant 32 : index
    %239 = vector.load %arg14[%c8_72, %c32_73] : memref<64x128xf32, #tpu.memory_space<vmem>>, vector<8x32xf32>
    tpu.vector_store %arg14[%c8_72, %c32_73], %237 {strides = array<i32>} : memref<64x128xf32, #tpu.memory_space<vmem>>, vector<8x32xf32>,
    %c8_74 = arith.constant 8 : index
    %c64_75 = arith.constant 64 : index
    %240 = vector.load %arg14[%c8_74, %c64_75] : memref<64x128xf32, #tpu.memory_space<vmem>>, vector<8x32xf32>
    tpu.vector_store %arg14[%c8_74, %c64_75], %236 {strides = array<i32>} : memref<64x128xf32, #tpu.memory_space<vmem>>, vector<8x32xf32>,
    %c48_76 = arith.constant 48 : index
    %c96_77 = arith.constant 96 : index
    %241 = vector.load %arg14[%c48_76, %c96_77] : memref<64x128xf32, #tpu.memory_space<vmem>>, vector<8x32xf32>
    tpu.vector_store %arg14[%c48_76, %c96_77], %237 {strides = array<i32>} : memref<64x128xf32, #tpu.memory_space<vmem>>, vector<8x32xf32>,
    %cst_78 = arith.constant dense<0.000000e+00> : vector<8x192xf32>
    %242 = tpu.matmul %235, %6, %cst_78 {dimension_numbers = #tpu.dot_dimension_numbers<[1], [0], [0], [1], [0, 0, 1, 1], [], []>} : vector<8x64xf32>, vector<64x192xf32>, vector<8x192xf32> -> vector<8x192xf32>
    %243 = vector.extract_strided_slice %5 {offsets = [56, 0], sizes = [8, 192], strides = [1, 1]} : vector<64x192xf32> to vector<8x192xf32>
    %244 = vector.extract_strided_slice %243 {offsets = [0, 0], sizes = [8, 64], strides = [1, 1]} : vector<8x192xf32> to vector<8x64xf32>
    %245 = vector.extract_strided_slice %242 {offsets = [0, 0], sizes = [8, 64], strides = [1, 1]} : vector<8x192xf32> to vector<8x64xf32>
    %246 = arith.addf %244, %245 : vector<8x64xf32>
    %247 = arith.negf %246 : vector<8x64xf32>
    %248 = math.exp %247 : vector<8x64xf32>
    %cst_79 = arith.constant 1.000000e+00 : f32
    %249 = vector.broadcast %cst_79 : f32 to vector<8x64xf32>
    %250 = arith.addf %249, %248 : vector<8x64xf32>
    %251 = arith.divf %249, %250 : vector<8x64xf32>
    %252 = vector.extract_strided_slice %243 {offsets = [0, 64], sizes = [8, 64], strides = [1, 1]} : vector<8x192xf32> to vector<8x64xf32>
    %253 = vector.extract_strided_slice %242 {offsets = [0, 64], sizes = [8, 64], strides = [1, 1]} : vector<8x192xf32> to vector<8x64xf32>
    %254 = arith.addf %252, %253 : vector<8x64xf32>
    %255 = arith.negf %254 : vector<8x64xf32>
    %256 = math.exp %255 : vector<8x64xf32>
    %cst_80 = arith.constant 1.000000e+00 : f32
    %257 = vector.broadcast %cst_80 : f32 to vector<8x64xf32>
    %258 = arith.addf %257, %256 : vector<8x64xf32>
    %259 = arith.divf %257, %258 : vector<8x64xf32>
    %260 = vector.extract_strided_slice %243 {offsets = [0, 128], sizes = [8, 64], strides = [1, 1]} : vector<8x192xf32> to vector<8x64xf32>
    %261 = vector.extract_strided_slice %242 {offsets = [0, 128], sizes = [8, 64], strides = [1, 1]} : vector<8x192xf32> to vector<8x64xf32>
    %262 = arith.addf %261, %9 : vector<8x64xf32>
    %263 = arith.mulf %251, %262 : vector<8x64xf32>
    %264 = arith.addf %260, %263 : vector<8x64xf32>
    %265 = math.tanh %264 : vector<8x64xf32>
    %266 = arith.subf %235, %265 : vector<8x64xf32>
    %267 = arith.mulf %259, %266 : vector<8x64xf32>
    %268 = arith.addf %265, %267 : vector<8x64xf32>
    %269 = vector.extract_strided_slice %268 {offsets = [0, 0], sizes = [8, 32], strides = [1, 1]} : vector<8x64xf32> to vector<8x32xf32>
    %270 = vector.extract_strided_slice %268 {offsets = [0, 32], sizes = [8, 32], strides = [1, 1]} : vector<8x64xf32> to vector<8x32xf32>
    %c56_81 = arith.constant 56 : index
    %c0_82 = arith.constant 0 : index
    %271 = vector.load %arg14[%c56_81, %c0_82] : memref<64x128xf32, #tpu.memory_space<vmem>>, vector<8x32xf32>
    tpu.vector_store %arg14[%c56_81, %c0_82], %269 {strides = array<i32>} : memref<64x128xf32, #tpu.memory_space<vmem>>, vector<8x32xf32>,
    %c0_83 = arith.constant 0 : index
    %c32_84 = arith.constant 32 : index
    %272 = vector.load %arg14[%c0_83, %c32_84] : memref<64x128xf32, #tpu.memory_space<vmem>>, vector<8x32xf32>
    tpu.vector_store %arg14[%c0_83, %c32_84], %270 {strides = array<i32>} : memref<64x128xf32, #tpu.memory_space<vmem>>, vector<8x32xf32>,
    %c0_85 = arith.constant 0 : index
    %c64_86 = arith.constant 64 : index
    %273 = vector.load %arg14[%c0_85, %c64_86] : memref<64x128xf32, #tpu.memory_space<vmem>>, vector<8x32xf32>
    tpu.vector_store %arg14[%c0_85, %c64_86], %269 {strides = array<i32>} : memref<64x128xf32, #tpu.memory_space<vmem>>, vector<8x32xf32>,
    %c56_87 = arith.constant 56 : index
    %c96_88 = arith.constant 96 : index
    %274 = vector.load %arg14[%c56_87, %c96_88] : memref<64x128xf32, #tpu.memory_space<vmem>>, vector<8x32xf32>
    tpu.vector_store %arg14[%c56_87, %c96_88], %270 {strides = array<i32>} : memref<64x128xf32, #tpu.memory_space<vmem>>, vector<8x32xf32>,
    %c0_89 = arith.constant 0 : index
    %c0_90 = arith.constant 0 : index
    %275 = vector.load %arg14[%c0_89, %c0_90] : memref<64x128xf32, #tpu.memory_space<vmem>>, vector<64x128xf32>
    %c0_91 = arith.constant 0 : index
    %c0_92 = arith.constant 0 : index
    %276 = vector.load %arg5[%c0_91, %c0_92] : memref<128x192xf32, #tpu.memory_space<vmem>>, vector<128x192xf32>
    %cst_93 = arith.constant dense<0.000000e+00> : vector<64x192xf32>
    %277 = tpu.matmul %275, %276, %cst_93 {dimension_numbers = #tpu.dot_dimension_numbers<[1], [0], [0], [1], [0, 0, 1, 1], [], []>} : vector<64x128xf32>, vector<128x192xf32>, vector<64x192xf32> -> vector<64x192xf32>
    %c0_94 = arith.constant 0 : index
    %c0_95 = arith.constant 0 : index
    %278 = vector.load %arg6[%c0_94, %c0_95] : memref<1x192xf32, #tpu.memory_space<vmem>>, vector<1x192xf32>
    %279 = vector.broadcast %278 : vector<1x192xf32> to vector<64x192xf32>
    %280 = arith.addf %277, %279 : vector<64x192xf32>
    %c0_96 = arith.constant 0 : index
    %c0_97 = arith.constant 0 : index
    %281 = vector.load %arg7[%c0_96, %c0_97] : memref<64x192xf32, #tpu.memory_space<vmem>>, vector<64x192xf32>
    %c0_98 = arith.constant 0 : index
    %c0_99 = arith.constant 0 : index
    %282 = vector.load %arg8[%c0_98, %c0_99] : memref<1x64xf32, #tpu.memory_space<vmem>>, vector<1x64xf32>
    %283 = vector.shape_cast %282 : vector<1x64xf32> to vector<1x64xf32>
    %284 = vector.broadcast %283 : vector<1x64xf32> to vector<8x64xf32>
    %cst_100 = arith.constant 0.000000e+00 : f32
    %285 = vector.broadcast %cst_100 : f32 to vector<8x64xf32>
    %cst_101 = arith.constant dense<0.000000e+00> : vector<8x192xf32>
    %286 = tpu.matmul %285, %281, %cst_101 {dimension_numbers = #tpu.dot_dimension_numbers<[1], [0], [0], [1], [0, 0, 1, 1], [], []>} : vector<8x64xf32>, vector<64x192xf32>, vector<8x192xf32> -> vector<8x192xf32>
    %287 = vector.extract_strided_slice %280 {offsets = [0, 0], sizes = [8, 192], strides = [1, 1]} : vector<64x192xf32> to vector<8x192xf32>
    %288 = vector.extract_strided_slice %287 {offsets = [0, 0], sizes = [8, 64], strides = [1, 1]} : vector<8x192xf32> to vector<8x64xf32>
    %289 = vector.extract_strided_slice %286 {offsets = [0, 0], sizes = [8, 64], strides = [1, 1]} : vector<8x192xf32> to vector<8x64xf32>
    %290 = arith.addf %288, %289 : vector<8x64xf32>
    %291 = arith.negf %290 : vector<8x64xf32>
    %292 = math.exp %291 : vector<8x64xf32>
    %cst_102 = arith.constant 1.000000e+00 : f32
    %293 = vector.broadcast %cst_102 : f32 to vector<8x64xf32>
    %294 = arith.addf %293, %292 : vector<8x64xf32>
    %295 = arith.divf %293, %294 : vector<8x64xf32>
    %296 = vector.extract_strided_slice %287 {offsets = [0, 64], sizes = [8, 64], strides = [1, 1]} : vector<8x192xf32> to vector<8x64xf32>
    %297 = vector.extract_strided_slice %286 {offsets = [0, 64], sizes = [8, 64], strides = [1, 1]} : vector<8x192xf32> to vector<8x64xf32>
    %298 = arith.addf %296, %297 : vector<8x64xf32>
    %299 = arith.negf %298 : vector<8x64xf32>
    %300 = math.exp %299 : vector<8x64xf32>
    %cst_103 = arith.constant 1.000000e+00 : f32
    %301 = vector.broadcast %cst_103 : f32 to vector<8x64xf32>
    %302 = arith.addf %301, %300 : vector<8x64xf32>
    %303 = arith.divf %301, %302 : vector<8x64xf32>
    %304 = vector.extract_strided_slice %287 {offsets = [0, 128], sizes = [8, 64], strides = [1, 1]} : vector<8x192xf32> to vector<8x64xf32>
    %305 = vector.extract_strided_slice %286 {offsets = [0, 128], sizes = [8, 64], strides = [1, 1]} : vector<8x192xf32> to vector<8x64xf32>
    %306 = arith.addf %305, %284 : vector<8x64xf32>
    %307 = arith.mulf %295, %306 : vector<8x64xf32>
    %308 = arith.addf %304, %307 : vector<8x64xf32>
    %309 = math.tanh %308 : vector<8x64xf32>
    %310 = arith.subf %285, %309 : vector<8x64xf32>
    %311 = arith.mulf %303, %310 : vector<8x64xf32>
    %312 = arith.addf %309, %311 : vector<8x64xf32>
    %313 = vector.extract_strided_slice %312 {offsets = [0, 0], sizes = [8, 32], strides = [1, 1]} : vector<8x64xf32> to vector<8x32xf32>
    %314 = vector.extract_strided_slice %312 {offsets = [0, 32], sizes = [8, 32], strides = [1, 1]} : vector<8x64xf32> to vector<8x32xf32>
    %c0_104 = arith.constant 0 : index
    %c0_105 = arith.constant 0 : index
    %315 = vector.load %arg15[%c0_104, %c0_105] : memref<64x64xf32, #tpu.memory_space<vmem>>, vector<8x32xf32>
    tpu.vector_store %arg15[%c0_104, %c0_105], %313 {strides = array<i32>} : memref<64x64xf32, #tpu.memory_space<vmem>>, vector<8x32xf32>,
    %c56_106 = arith.constant 56 : index
    %c32_107 = arith.constant 32 : index
    %316 = vector.load %arg15[%c56_106, %c32_107] : memref<64x64xf32, #tpu.memory_space<vmem>>, vector<8x32xf32>
    tpu.vector_store %arg15[%c56_106, %c32_107], %314 {strides = array<i32>} : memref<64x64xf32, #tpu.memory_space<vmem>>, vector<8x32xf32>,
    %cst_108 = arith.constant dense<0.000000e+00> : vector<8x192xf32>
    %317 = tpu.matmul %312, %281, %cst_108 {dimension_numbers = #tpu.dot_dimension_numbers<[1], [0], [0], [1], [0, 0, 1, 1], [], []>} : vector<8x64xf32>, vector<64x192xf32>, vector<8x192xf32> -> vector<8x192xf32>
    %318 = vector.extract_strided_slice %280 {offsets = [8, 0], sizes = [8, 192], strides = [1, 1]} : vector<64x192xf32> to vector<8x192xf32>
    %319 = vector.extract_strided_slice %318 {offsets = [0, 0], sizes = [8, 64], strides = [1, 1]} : vector<8x192xf32> to vector<8x64xf32>
    %320 = vector.extract_strided_slice %317 {offsets = [0, 0], sizes = [8, 64], strides = [1, 1]} : vector<8x192xf32> to vector<8x64xf32>
    %321 = arith.addf %319, %320 : vector<8x64xf32>
    %322 = arith.negf %321 : vector<8x64xf32>
    %323 = math.exp %322 : vector<8x64xf32>
    %cst_109 = arith.constant 1.000000e+00 : f32
    %324 = vector.broadcast %cst_109 : f32 to vector<8x64xf32>
    %325 = arith.addf %324, %323 : vector<8x64xf32>
    %326 = arith.divf %324, %325 : vector<8x64xf32>
    %327 = vector.extract_strided_slice %318 {offsets = [0, 64], sizes = [8, 64], strides = [1, 1]} : vector<8x192xf32> to vector<8x64xf32>
    %328 = vector.extract_strided_slice %317 {offsets = [0, 64], sizes = [8, 64], strides = [1, 1]} : vector<8x192xf32> to vector<8x64xf32>
    %329 = arith.addf %327, %328 : vector<8x64xf32>
    %330 = arith.negf %329 : vector<8x64xf32>
    %331 = math.exp %330 : vector<8x64xf32>
    %cst_110 = arith.constant 1.000000e+00 : f32
    %332 = vector.broadcast %cst_110 : f32 to vector<8x64xf32>
    %333 = arith.addf %332, %331 : vector<8x64xf32>
    %334 = arith.divf %332, %333 : vector<8x64xf32>
    %335 = vector.extract_strided_slice %318 {offsets = [0, 128], sizes = [8, 64], strides = [1, 1]} : vector<8x192xf32> to vector<8x64xf32>
    %336 = vector.extract_strided_slice %317 {offsets = [0, 128], sizes = [8, 64], strides = [1, 1]} : vector<8x192xf32> to vector<8x64xf32>
    %337 = arith.addf %336, %284 : vector<8x64xf32>
    %338 = arith.mulf %326, %337 : vector<8x64xf32>
    %339 = arith.addf %335, %338 : vector<8x64xf32>
    %340 = math.tanh %339 : vector<8x64xf32>
    %341 = arith.subf %312, %340 : vector<8x64xf32>
    %342 = arith.mulf %334, %341 : vector<8x64xf32>
    %343 = arith.addf %340, %342 : vector<8x64xf32>
    %344 = vector.extract_strided_slice %343 {offsets = [0, 0], sizes = [8, 32], strides = [1, 1]} : vector<8x64xf32> to vector<8x32xf32>
    %345 = vector.extract_strided_slice %343 {offsets = [0, 32], sizes = [8, 32], strides = [1, 1]} : vector<8x64xf32> to vector<8x32xf32>
    %c8_111 = arith.constant 8 : index
    %c0_112 = arith.constant 0 : index
    %346 = vector.load %arg15[%c8_111, %c0_112] : memref<64x64xf32, #tpu.memory_space<vmem>>, vector<8x32xf32>
    tpu.vector_store %arg15[%c8_111, %c0_112], %344 {strides = array<i32>} : memref<64x64xf32, #tpu.memory_space<vmem>>, vector<8x32xf32>,
    %c48_113 = arith.constant 48 : index
    %c32_114 = arith.constant 32 : index
    %347 = vector.load %arg15[%c48_113, %c32_114] : memref<64x64xf32, #tpu.memory_space<vmem>>, vector<8x32xf32>
    tpu.vector_store %arg15[%c48_113, %c32_114], %345 {strides = array<i32>} : memref<64x64xf32, #tpu.memory_space<vmem>>, vector<8x32xf32>,
    %cst_115 = arith.constant dense<0.000000e+00> : vector<8x192xf32>
    %348 = tpu.matmul %343, %281, %cst_115 {dimension_numbers = #tpu.dot_dimension_numbers<[1], [0], [0], [1], [0, 0, 1, 1], [], []>} : vector<8x64xf32>, vector<64x192xf32>, vector<8x192xf32> -> vector<8x192xf32>
    %349 = vector.extract_strided_slice %280 {offsets = [16, 0], sizes = [8, 192], strides = [1, 1]} : vector<64x192xf32> to vector<8x192xf32>
    %350 = vector.extract_strided_slice %349 {offsets = [0, 0], sizes = [8, 64], strides = [1, 1]} : vector<8x192xf32> to vector<8x64xf32>
    %351 = vector.extract_strided_slice %348 {offsets = [0, 0], sizes = [8, 64], strides = [1, 1]} : vector<8x192xf32> to vector<8x64xf32>
    %352 = arith.addf %350, %351 : vector<8x64xf32>
    %353 = arith.negf %352 : vector<8x64xf32>
    %354 = math.exp %353 : vector<8x64xf32>
    %cst_116 = arith.constant 1.000000e+00 : f32
    %355 = vector.broadcast %cst_116 : f32 to vector<8x64xf32>
    %356 = arith.addf %355, %354 : vector<8x64xf32>
    %357 = arith.divf %355, %356 : vector<8x64xf32>
    %358 = vector.extract_strided_slice %349 {offsets = [0, 64], sizes = [8, 64], strides = [1, 1]} : vector<8x192xf32> to vector<8x64xf32>
    %359 = vector.extract_strided_slice %348 {offsets = [0, 64], sizes = [8, 64], strides = [1, 1]} : vector<8x192xf32> to vector<8x64xf32>
    %360 = arith.addf %358, %359 : vector<8x64xf32>
    %361 = arith.negf %360 : vector<8x64xf32>
    %362 = math.exp %361 : vector<8x64xf32>
    %cst_117 = arith.constant 1.000000e+00 : f32
    %363 = vector.broadcast %cst_117 : f32 to vector<8x64xf32>
    %364 = arith.addf %363, %362 : vector<8x64xf32>
    %365 = arith.divf %363, %364 : vector<8x64xf32>
    %366 = vector.extract_strided_slice %349 {offsets = [0, 128], sizes = [8, 64], strides = [1, 1]} : vector<8x192xf32> to vector<8x64xf32>
    %367 = vector.extract_strided_slice %348 {offsets = [0, 128], sizes = [8, 64], strides = [1, 1]} : vector<8x192xf32> to vector<8x64xf32>
    %368 = arith.addf %367, %284 : vector<8x64xf32>
    %369 = arith.mulf %357, %368 : vector<8x64xf32>
    %370 = arith.addf %366, %369 : vector<8x64xf32>
    %371 = math.tanh %370 : vector<8x64xf32>
    %372 = arith.subf %343, %371 : vector<8x64xf32>
    %373 = arith.mulf %365, %372 : vector<8x64xf32>
    %374 = arith.addf %371, %373 : vector<8x64xf32>
    %375 = vector.extract_strided_slice %374 {offsets = [0, 0], sizes = [8, 32], strides = [1, 1]} : vector<8x64xf32> to vector<8x32xf32>
    %376 = vector.extract_strided_slice %374 {offsets = [0, 32], sizes = [8, 32], strides = [1, 1]} : vector<8x64xf32> to vector<8x32xf32>
    %c16_118 = arith.constant 16 : index
    %c0_119 = arith.constant 0 : index
    %377 = vector.load %arg15[%c16_118, %c0_119] : memref<64x64xf32, #tpu.memory_space<vmem>>, vector<8x32xf32>
    tpu.vector_store %arg15[%c16_118, %c0_119], %375 {strides = array<i32>} : memref<64x64xf32, #tpu.memory_space<vmem>>, vector<8x32xf32>,
    %c40_120 = arith.constant 40 : index
    %c32_121 = arith.constant 32 : index
    %378 = vector.load %arg15[%c40_120, %c32_121] : memref<64x64xf32, #tpu.memory_space<vmem>>, vector<8x32xf32>
    tpu.vector_store %arg15[%c40_120, %c32_121], %376 {strides = array<i32>} : memref<64x64xf32, #tpu.memory_space<vmem>>, vector<8x32xf32>,
    %cst_122 = arith.constant dense<0.000000e+00> : vector<8x192xf32>
    %379 = tpu.matmul %374, %281, %cst_122 {dimension_numbers = #tpu.dot_dimension_numbers<[1], [0], [0], [1], [0, 0, 1, 1], [], []>} : vector<8x64xf32>, vector<64x192xf32>, vector<8x192xf32> -> vector<8x192xf32>
    %380 = vector.extract_strided_slice %280 {offsets = [24, 0], sizes = [8, 192], strides = [1, 1]} : vector<64x192xf32> to vector<8x192xf32>
    %381 = vector.extract_strided_slice %380 {offsets = [0, 0], sizes = [8, 64], strides = [1, 1]} : vector<8x192xf32> to vector<8x64xf32>
    %382 = vector.extract_strided_slice %379 {offsets = [0, 0], sizes = [8, 64], strides = [1, 1]} : vector<8x192xf32> to vector<8x64xf32>
    %383 = arith.addf %381, %382 : vector<8x64xf32>
    %384 = arith.negf %383 : vector<8x64xf32>
    %385 = math.exp %384 : vector<8x64xf32>
    %cst_123 = arith.constant 1.000000e+00 : f32
    %386 = vector.broadcast %cst_123 : f32 to vector<8x64xf32>
    %387 = arith.addf %386, %385 : vector<8x64xf32>
    %388 = arith.divf %386, %387 : vector<8x64xf32>
    %389 = vector.extract_strided_slice %380 {offsets = [0, 64], sizes = [8, 64], strides = [1, 1]} : vector<8x192xf32> to vector<8x64xf32>
    %390 = vector.extract_strided_slice %379 {offsets = [0, 64], sizes = [8, 64], strides = [1, 1]} : vector<8x192xf32> to vector<8x64xf32>
    %391 = arith.addf %389, %390 : vector<8x64xf32>
    %392 = arith.negf %391 : vector<8x64xf32>
    %393 = math.exp %392 : vector<8x64xf32>
    %cst_124 = arith.constant 1.000000e+00 : f32
    %394 = vector.broadcast %cst_124 : f32 to vector<8x64xf32>
    %395 = arith.addf %394, %393 : vector<8x64xf32>
    %396 = arith.divf %394, %395 : vector<8x64xf32>
    %397 = vector.extract_strided_slice %380 {offsets = [0, 128], sizes = [8, 64], strides = [1, 1]} : vector<8x192xf32> to vector<8x64xf32>
    %398 = vector.extract_strided_slice %379 {offsets = [0, 128], sizes = [8, 64], strides = [1, 1]} : vector<8x192xf32> to vector<8x64xf32>
    %399 = arith.addf %398, %284 : vector<8x64xf32>
    %400 = arith.mulf %388, %399 : vector<8x64xf32>
    %401 = arith.addf %397, %400 : vector<8x64xf32>
    %402 = math.tanh %401 : vector<8x64xf32>
    %403 = arith.subf %374, %402 : vector<8x64xf32>
    %404 = arith.mulf %396, %403 : vector<8x64xf32>
    %405 = arith.addf %402, %404 : vector<8x64xf32>
    %406 = vector.extract_strided_slice %405 {offsets = [0, 0], sizes = [8, 32], strides = [1, 1]} : vector<8x64xf32> to vector<8x32xf32>
    %407 = vector.extract_strided_slice %405 {offsets = [0, 32], sizes = [8, 32], strides = [1, 1]} : vector<8x64xf32> to vector<8x32xf32>
    %c24_125 = arith.constant 24 : index
    %c0_126 = arith.constant 0 : index
    %408 = vector.load %arg15[%c24_125, %c0_126] : memref<64x64xf32, #tpu.memory_space<vmem>>, vector<8x32xf32>
    tpu.vector_store %arg15[%c24_125, %c0_126], %406 {strides = array<i32>} : memref<64x64xf32, #tpu.memory_space<vmem>>, vector<8x32xf32>,
    %c32_127 = arith.constant 32 : index
    %c32_128 = arith.constant 32 : index
    %409 = vector.load %arg15[%c32_127, %c32_128] : memref<64x64xf32, #tpu.memory_space<vmem>>, vector<8x32xf32>
    tpu.vector_store %arg15[%c32_127, %c32_128], %407 {strides = array<i32>} : memref<64x64xf32, #tpu.memory_space<vmem>>, vector<8x32xf32>,
    %cst_129 = arith.constant dense<0.000000e+00> : vector<8x192xf32>
    %410 = tpu.matmul %405, %281, %cst_129 {dimension_numbers = #tpu.dot_dimension_numbers<[1], [0], [0], [1], [0, 0, 1, 1], [], []>} : vector<8x64xf32>, vector<64x192xf32>, vector<8x192xf32> -> vector<8x192xf32>
    %411 = vector.extract_strided_slice %280 {offsets = [32, 0], sizes = [8, 192], strides = [1, 1]} : vector<64x192xf32> to vector<8x192xf32>
    %412 = vector.extract_strided_slice %411 {offsets = [0, 0], sizes = [8, 64], strides = [1, 1]} : vector<8x192xf32> to vector<8x64xf32>
    %413 = vector.extract_strided_slice %410 {offsets = [0, 0], sizes = [8, 64], strides = [1, 1]} : vector<8x192xf32> to vector<8x64xf32>
    %414 = arith.addf %412, %413 : vector<8x64xf32>
    %415 = arith.negf %414 : vector<8x64xf32>
    %416 = math.exp %415 : vector<8x64xf32>
    %cst_130 = arith.constant 1.000000e+00 : f32
    %417 = vector.broadcast %cst_130 : f32 to vector<8x64xf32>
    %418 = arith.addf %417, %416 : vector<8x64xf32>
    %419 = arith.divf %417, %418 : vector<8x64xf32>
    %420 = vector.extract_strided_slice %411 {offsets = [0, 64], sizes = [8, 64], strides = [1, 1]} : vector<8x192xf32> to vector<8x64xf32>
    %421 = vector.extract_strided_slice %410 {offsets = [0, 64], sizes = [8, 64], strides = [1, 1]} : vector<8x192xf32> to vector<8x64xf32>
    %422 = arith.addf %420, %421 : vector<8x64xf32>
    %423 = arith.negf %422 : vector<8x64xf32>
    %424 = math.exp %423 : vector<8x64xf32>
    %cst_131 = arith.constant 1.000000e+00 : f32
    %425 = vector.broadcast %cst_131 : f32 to vector<8x64xf32>
    %426 = arith.addf %425, %424 : vector<8x64xf32>
    %427 = arith.divf %425, %426 : vector<8x64xf32>
    %428 = vector.extract_strided_slice %411 {offsets = [0, 128], sizes = [8, 64], strides = [1, 1]} : vector<8x192xf32> to vector<8x64xf32>
    %429 = vector.extract_strided_slice %410 {offsets = [0, 128], sizes = [8, 64], strides = [1, 1]} : vector<8x192xf32> to vector<8x64xf32>
    %430 = arith.addf %429, %284 : vector<8x64xf32>
    %431 = arith.mulf %419, %430 : vector<8x64xf32>
    %432 = arith.addf %428, %431 : vector<8x64xf32>
    %433 = math.tanh %432 : vector<8x64xf32>
    %434 = arith.subf %405, %433 : vector<8x64xf32>
    %435 = arith.mulf %427, %434 : vector<8x64xf32>
    %436 = arith.addf %433, %435 : vector<8x64xf32>
    %437 = vector.extract_strided_slice %436 {offsets = [0, 0], sizes = [8, 32], strides = [1, 1]} : vector<8x64xf32> to vector<8x32xf32>
    %438 = vector.extract_strided_slice %436 {offsets = [0, 32], sizes = [8, 32], strides = [1, 1]} : vector<8x64xf32> to vector<8x32xf32>
    %c32_132 = arith.constant 32 : index
    %c0_133 = arith.constant 0 : index
    %439 = vector.load %arg15[%c32_132, %c0_133] : memref<64x64xf32, #tpu.memory_space<vmem>>, vector<8x32xf32>
    tpu.vector_store %arg15[%c32_132, %c0_133], %437 {strides = array<i32>} : memref<64x64xf32, #tpu.memory_space<vmem>>, vector<8x32xf32>,
    %c24_134 = arith.constant 24 : index
    %c32_135 = arith.constant 32 : index
    %440 = vector.load %arg15[%c24_134, %c32_135] : memref<64x64xf32, #tpu.memory_space<vmem>>, vector<8x32xf32>
    tpu.vector_store %arg15[%c24_134, %c32_135], %438 {strides = array<i32>} : memref<64x64xf32, #tpu.memory_space<vmem>>, vector<8x32xf32>,
    %cst_136 = arith.constant dense<0.000000e+00> : vector<8x192xf32>
    %441 = tpu.matmul %436, %281, %cst_136 {dimension_numbers = #tpu.dot_dimension_numbers<[1], [0], [0], [1], [0, 0, 1, 1], [], []>} : vector<8x64xf32>, vector<64x192xf32>, vector<8x192xf32> -> vector<8x192xf32>
    %442 = vector.extract_strided_slice %280 {offsets = [40, 0], sizes = [8, 192], strides = [1, 1]} : vector<64x192xf32> to vector<8x192xf32>
    %443 = vector.extract_strided_slice %442 {offsets = [0, 0], sizes = [8, 64], strides = [1, 1]} : vector<8x192xf32> to vector<8x64xf32>
    %444 = vector.extract_strided_slice %441 {offsets = [0, 0], sizes = [8, 64], strides = [1, 1]} : vector<8x192xf32> to vector<8x64xf32>
    %445 = arith.addf %443, %444 : vector<8x64xf32>
    %446 = arith.negf %445 : vector<8x64xf32>
    %447 = math.exp %446 : vector<8x64xf32>
    %cst_137 = arith.constant 1.000000e+00 : f32
    %448 = vector.broadcast %cst_137 : f32 to vector<8x64xf32>
    %449 = arith.addf %448, %447 : vector<8x64xf32>
    %450 = arith.divf %448, %449 : vector<8x64xf32>
    %451 = vector.extract_strided_slice %442 {offsets = [0, 64], sizes = [8, 64], strides = [1, 1]} : vector<8x192xf32> to vector<8x64xf32>
    %452 = vector.extract_strided_slice %441 {offsets = [0, 64], sizes = [8, 64], strides = [1, 1]} : vector<8x192xf32> to vector<8x64xf32>
    %453 = arith.addf %451, %452 : vector<8x64xf32>
    %454 = arith.negf %453 : vector<8x64xf32>
    %455 = math.exp %454 : vector<8x64xf32>
    %cst_138 = arith.constant 1.000000e+00 : f32
    %456 = vector.broadcast %cst_138 : f32 to vector<8x64xf32>
    %457 = arith.addf %456, %455 : vector<8x64xf32>
    %458 = arith.divf %456, %457 : vector<8x64xf32>
    %459 = vector.extract_strided_slice %442 {offsets = [0, 128], sizes = [8, 64], strides = [1, 1]} : vector<8x192xf32> to vector<8x64xf32>
    %460 = vector.extract_strided_slice %441 {offsets = [0, 128], sizes = [8, 64], strides = [1, 1]} : vector<8x192xf32> to vector<8x64xf32>
    %461 = arith.addf %460, %284 : vector<8x64xf32>
    %462 = arith.mulf %450, %461 : vector<8x64xf32>
    %463 = arith.addf %459, %462 : vector<8x64xf32>
    %464 = math.tanh %463 : vector<8x64xf32>
    %465 = arith.subf %436, %464 : vector<8x64xf32>
    %466 = arith.mulf %458, %465 : vector<8x64xf32>
    %467 = arith.addf %464, %466 : vector<8x64xf32>
    %468 = vector.extract_strided_slice %467 {offsets = [0, 0], sizes = [8, 32], strides = [1, 1]} : vector<8x64xf32> to vector<8x32xf32>
    %469 = vector.extract_strided_slice %467 {offsets = [0, 32], sizes = [8, 32], strides = [1, 1]} : vector<8x64xf32> to vector<8x32xf32>
    %c40_139 = arith.constant 40 : index
    %c0_140 = arith.constant 0 : index
    %470 = vector.load %arg15[%c40_139, %c0_140] : memref<64x64xf32, #tpu.memory_space<vmem>>, vector<8x32xf32>
    tpu.vector_store %arg15[%c40_139, %c0_140], %468 {strides = array<i32>} : memref<64x64xf32, #tpu.memory_space<vmem>>, vector<8x32xf32>,
    %c16_141 = arith.constant 16 : index
    %c32_142 = arith.constant 32 : index
    %471 = vector.load %arg15[%c16_141, %c32_142] : memref<64x64xf32, #tpu.memory_space<vmem>>, vector<8x32xf32>
    tpu.vector_store %arg15[%c16_141, %c32_142], %469 {strides = array<i32>} : memref<64x64xf32, #tpu.memory_space<vmem>>, vector<8x32xf32>,
    %cst_143 = arith.constant dense<0.000000e+00> : vector<8x192xf32>
    %472 = tpu.matmul %467, %281, %cst_143 {dimension_numbers = #tpu.dot_dimension_numbers<[1], [0], [0], [1], [0, 0, 1, 1], [], []>} : vector<8x64xf32>, vector<64x192xf32>, vector<8x192xf32> -> vector<8x192xf32>
    %473 = vector.extract_strided_slice %280 {offsets = [48, 0], sizes = [8, 192], strides = [1, 1]} : vector<64x192xf32> to vector<8x192xf32>
    %474 = vector.extract_strided_slice %473 {offsets = [0, 0], sizes = [8, 64], strides = [1, 1]} : vector<8x192xf32> to vector<8x64xf32>
    %475 = vector.extract_strided_slice %472 {offsets = [0, 0], sizes = [8, 64], strides = [1, 1]} : vector<8x192xf32> to vector<8x64xf32>
    %476 = arith.addf %474, %475 : vector<8x64xf32>
    %477 = arith.negf %476 : vector<8x64xf32>
    %478 = math.exp %477 : vector<8x64xf32>
    %cst_144 = arith.constant 1.000000e+00 : f32
    %479 = vector.broadcast %cst_144 : f32 to vector<8x64xf32>
    %480 = arith.addf %479, %478 : vector<8x64xf32>
    %481 = arith.divf %479, %480 : vector<8x64xf32>
    %482 = vector.extract_strided_slice %473 {offsets = [0, 64], sizes = [8, 64], strides = [1, 1]} : vector<8x192xf32> to vector<8x64xf32>
    %483 = vector.extract_strided_slice %472 {offsets = [0, 64], sizes = [8, 64], strides = [1, 1]} : vector<8x192xf32> to vector<8x64xf32>
    %484 = arith.addf %482, %483 : vector<8x64xf32>
    %485 = arith.negf %484 : vector<8x64xf32>
    %486 = math.exp %485 : vector<8x64xf32>
    %cst_145 = arith.constant 1.000000e+00 : f32
    %487 = vector.broadcast %cst_145 : f32 to vector<8x64xf32>
    %488 = arith.addf %487, %486 : vector<8x64xf32>
    %489 = arith.divf %487, %488 : vector<8x64xf32>
    %490 = vector.extract_strided_slice %473 {offsets = [0, 128], sizes = [8, 64], strides = [1, 1]} : vector<8x192xf32> to vector<8x64xf32>
    %491 = vector.extract_strided_slice %472 {offsets = [0, 128], sizes = [8, 64], strides = [1, 1]} : vector<8x192xf32> to vector<8x64xf32>
    %492 = arith.addf %491, %284 : vector<8x64xf32>
    %493 = arith.mulf %481, %492 : vector<8x64xf32>
    %494 = arith.addf %490, %493 : vector<8x64xf32>
    %495 = math.tanh %494 : vector<8x64xf32>
    %496 = arith.subf %467, %495 : vector<8x64xf32>
    %497 = arith.mulf %489, %496 : vector<8x64xf32>
    %498 = arith.addf %495, %497 : vector<8x64xf32>
    %499 = vector.extract_strided_slice %498 {offsets = [0, 0], sizes = [8, 32], strides = [1, 1]} : vector<8x64xf32> to vector<8x32xf32>
    %500 = vector.extract_strided_slice %498 {offsets = [0, 32], sizes = [8, 32], strides = [1, 1]} : vector<8x64xf32> to vector<8x32xf32>
    %c48_146 = arith.constant 48 : index
    %c0_147 = arith.constant 0 : index
    %501 = vector.load %arg15[%c48_146, %c0_147] : memref<64x64xf32, #tpu.memory_space<vmem>>, vector<8x32xf32>
    tpu.vector_store %arg15[%c48_146, %c0_147], %499 {strides = array<i32>} : memref<64x64xf32, #tpu.memory_space<vmem>>, vector<8x32xf32>,
    %c8_148 = arith.constant 8 : index
    %c32_149 = arith.constant 32 : index
    %502 = vector.load %arg15[%c8_148, %c32_149] : memref<64x64xf32, #tpu.memory_space<vmem>>, vector<8x32xf32>
    tpu.vector_store %arg15[%c8_148, %c32_149], %500 {strides = array<i32>} : memref<64x64xf32, #tpu.memory_space<vmem>>, vector<8x32xf32>,
    %cst_150 = arith.constant dense<0.000000e+00> : vector<8x192xf32>
    %503 = tpu.matmul %498, %281, %cst_150 {dimension_numbers = #tpu.dot_dimension_numbers<[1], [0], [0], [1], [0, 0, 1, 1], [], []>} : vector<8x64xf32>, vector<64x192xf32>, vector<8x192xf32> -> vector<8x192xf32>
    %504 = vector.extract_strided_slice %280 {offsets = [56, 0], sizes = [8, 192], strides = [1, 1]} : vector<64x192xf32> to vector<8x192xf32>
    %505 = vector.extract_strided_slice %504 {offsets = [0, 0], sizes = [8, 64], strides = [1, 1]} : vector<8x192xf32> to vector<8x64xf32>
    %506 = vector.extract_strided_slice %503 {offsets = [0, 0], sizes = [8, 64], strides = [1, 1]} : vector<8x192xf32> to vector<8x64xf32>
    %507 = arith.addf %505, %506 : vector<8x64xf32>
    %508 = arith.negf %507 : vector<8x64xf32>
    %509 = math.exp %508 : vector<8x64xf32>
    %cst_151 = arith.constant 1.000000e+00 : f32
    %510 = vector.broadcast %cst_151 : f32 to vector<8x64xf32>
    %511 = arith.addf %510, %509 : vector<8x64xf32>
    %512 = arith.divf %510, %511 : vector<8x64xf32>
    %513 = vector.extract_strided_slice %504 {offsets = [0, 64], sizes = [8, 64], strides = [1, 1]} : vector<8x192xf32> to vector<8x64xf32>
    %514 = vector.extract_strided_slice %503 {offsets = [0, 64], sizes = [8, 64], strides = [1, 1]} : vector<8x192xf32> to vector<8x64xf32>
    %515 = arith.addf %513, %514 : vector<8x64xf32>
    %516 = arith.negf %515 : vector<8x64xf32>
    %517 = math.exp %516 : vector<8x64xf32>
    %cst_152 = arith.constant 1.000000e+00 : f32
    %518 = vector.broadcast %cst_152 : f32 to vector<8x64xf32>
    %519 = arith.addf %518, %517 : vector<8x64xf32>
    %520 = arith.divf %518, %519 : vector<8x64xf32>
    %521 = vector.extract_strided_slice %504 {offsets = [0, 128], sizes = [8, 64], strides = [1, 1]} : vector<8x192xf32> to vector<8x64xf32>
    %522 = vector.extract_strided_slice %503 {offsets = [0, 128], sizes = [8, 64], strides = [1, 1]} : vector<8x192xf32> to vector<8x64xf32>
    %523 = arith.addf %522, %284 : vector<8x64xf32>
    %524 = arith.mulf %512, %523 : vector<8x64xf32>
    %525 = arith.addf %521, %524 : vector<8x64xf32>
    %526 = math.tanh %525 : vector<8x64xf32>
    %527 = arith.subf %498, %526 : vector<8x64xf32>
    %528 = arith.mulf %520, %527 : vector<8x64xf32>
    %529 = arith.addf %526, %528 : vector<8x64xf32>
    %530 = vector.extract_strided_slice %529 {offsets = [0, 0], sizes = [8, 32], strides = [1, 1]} : vector<8x64xf32> to vector<8x32xf32>
    %531 = vector.extract_strided_slice %529 {offsets = [0, 32], sizes = [8, 32], strides = [1, 1]} : vector<8x64xf32> to vector<8x32xf32>
    %c56_153 = arith.constant 56 : index
    %c0_154 = arith.constant 0 : index
    %532 = vector.load %arg15[%c56_153, %c0_154] : memref<64x64xf32, #tpu.memory_space<vmem>>, vector<8x32xf32>
    tpu.vector_store %arg15[%c56_153, %c0_154], %530 {strides = array<i32>} : memref<64x64xf32, #tpu.memory_space<vmem>>, vector<8x32xf32>,
    %c0_155 = arith.constant 0 : index
    %c32_156 = arith.constant 32 : index
    %533 = vector.load %arg15[%c0_155, %c32_156] : memref<64x64xf32, #tpu.memory_space<vmem>>, vector<8x32xf32>
    tpu.vector_store %arg15[%c0_155, %c32_156], %531 {strides = array<i32>} : memref<64x64xf32, #tpu.memory_space<vmem>>, vector<8x32xf32>,
    %c0_157 = arith.constant 0 : index
    %c0_158 = arith.constant 0 : index
    %534 = vector.load %arg15[%c0_157, %c0_158] : memref<64x64xf32, #tpu.memory_space<vmem>>, vector<64x64xf32>
    %c0_159 = arith.constant 0 : index
    %c0_160 = arith.constant 0 : index
    %535 = vector.load %arg9[%c0_159, %c0_160] : memref<64x16xf32, #tpu.memory_space<vmem>>, vector<64x16xf32>
    %cst_161 = arith.constant dense<0.000000e+00> : vector<64x16xf32>
    %536 = tpu.matmul %534, %535, %cst_161 {dimension_numbers = #tpu.dot_dimension_numbers<[1], [0], [0], [1], [0, 0, 1, 1], [], []>} : vector<64x64xf32>, vector<64x16xf32>, vector<64x16xf32> -> vector<64x16xf32>
    %c0_162 = arith.constant 0 : index
    %c0_163 = arith.constant 0 : index
    %537 = vector.load %arg10[%c0_162, %c0_163] : memref<1x16xf32, #tpu.memory_space<vmem>>, vector<1x16xf32>
    %538 = vector.broadcast %537 : vector<1x16xf32> to vector<64x16xf32>
    %539 = arith.addf %536, %538 : vector<64x16xf32>
    %cst_164 = arith.constant 0.000000e+00 : f32
    %540 = vector.broadcast %cst_164 : f32 to vector<64x16xf32>
    %541 = arith.maximumf %539, %540 : vector<64x16xf32>
    %c0_165 = arith.constant 0 : index
    %c0_166 = arith.constant 0 : index
    %542 = vector.load %arg11[%c0_165, %c0_166] : memref<16x16xf32, #tpu.memory_space<vmem>>, vector<16x16xf32>
    %cst_167 = arith.constant dense<0.000000e+00> : vector<64x16xf32>
    %543 = tpu.matmul %541, %542, %cst_167 {dimension_numbers = #tpu.dot_dimension_numbers<[1], [0], [0], [1], [0, 0, 1, 1], [], []>} : vector<64x16xf32>, vector<16x16xf32>, vector<64x16xf32> -> vector<64x16xf32>
    %c0_168 = arith.constant 0 : index
    %c0_169 = arith.constant 0 : index
    %544 = vector.load %arg12[%c0_168, %c0_169] : memref<1x16xf32, #tpu.memory_space<vmem>>, vector<1x16xf32>
    %545 = vector.broadcast %544 : vector<1x16xf32> to vector<64x16xf32>
    %546 = arith.addf %543, %545 : vector<64x16xf32>
    %c0_170 = arith.constant 0 : index
    %c0_171 = arith.constant 0 : index
    %547 = vector.load %arg13[%c0_170, %c0_171] : memref<64x16xf32, #tpu.memory_space<vmem>>, vector<64x16xf32>
    tpu.vector_store %arg13[%c0_170, %c0_171], %546 {strides = array<i32>} : memref<64x16xf32, #tpu.memory_space<vmem>>, vector<64x16xf32>,
    return
  }
}

</mosaic_0001>

<bundles_post_ra>
// kernel: e2eet_forward.1
= control target key start
LH: loop header
LB: loop body
LE: loop exit
PB: predicated region body
PF: predicated region fallthrough
CT: control target
= control target key end

     0   :  { %v2900_v3 = vmov 0.0   ;;  %vm80_vm0 = vcmask 523264   ;;  %v70_v50 = vlaneseq  ;;  %vm337_vm1 = vcmask 261120   ;;  %s3806_s1 = inlined_call_operand.vmem [shape: f32[64,192], index: 1, kind: input, shape index: {}]   ;;  %s3807_s3 = inlined_call_operand.vmem [shape: f32[64,192], index: 3, kind: input, shape index: {}]   ;;  %s3808_s0 = inlined_call_operand.vmem [shape: f32[64,64], index: 0, kind: input, shape index: {}]   ;;  %s3809_s2 = inlined_call_operand.vmem [shape: f32[1,192], index: 2, kind: input, shape index: {}]   ;;  %s3810_s4 = inlined_call_operand.vmem [shape: f32[1,64], index: 4, kind: input, shape index: {}]   ;;  %s3811_s5 = inlined_call_operand.vmem [shape: f32[128,192], index: 5, kind: input, shape index: {}]   ;;  %s3812_s7 = inlined_call_operand.vmem [shape: f32[64,192], index: 7, kind: input, shape index: {}]   ;;  %s3813_s6 = inlined_call_operand.vmem [shape: f32[1,192], index: 6, kind: input, shape index: {}]   ;;  %s3814_s8 = inlined_call_operand.vmem [shape: f32[1,64], index: 8, kind: input, shape index: {}]   ;;  %s3815_s9 = inlined_call_operand.vmem [shape: f32[64,16], index: 9, kind: input, shape index: {}]   ;;  %s3816_s11 = inlined_call_operand.vmem [shape: f32[16,16], index: 11, kind: input, shape index: {}]   ;;  %s3817_s10 = inlined_call_operand.vmem [shape: f32[1,16], index: 10, kind: input, shape index: {}]   ;;  %s3818_s12 = inlined_call_operand.vmem [shape: f32[1,16], index: 12, kind: input, shape index: {}]   ;;  %s3819_s13 = inlined_call_operand.vmem [shape: f32[64,16], index: 13, kind: output, shape index: {}]  }
   0x1   :  { %v53_v0 = vld [vmem:[%s3806_s1 + $0x8] sm:$0xff]  ;;  %v55_v1 = vld [vmem:[%s3806_s1 + $0x18] sm:$0xff]  ;;  %v52_v2 = vld [vmem:[%s3806_s1] sm:$0xff]  ;;  %169 = vmatprep.mubr.f32.mxu0 %v2900_v3  ;;  %308 = vmatprep.mubr.f32.mxu1 %v2900_v3  ;;  %vm339_vm2 = vcmask 523520   ;;  %vm345_vm3 = vcmask 785920   ;;  %vm347_vm4 = vcmask 1048320  }
   0x2   :  { %v2478_v4 = vpack.c.bf16 %v55_v1, %v53_v0  ;;  %v54_v5 = vld [vmem:[%s3806_s1 + $0x10] sm:$0xff]  ;;  %v219_v6 = vld [vmem:[%s3807_s3 + $0x8] sm:$0xff]  ;;  %v221_v7 = vld [vmem:[%s3807_s3 + $0x18] sm:$0xff]  ;;  %v3119_v51 = vshrl.u32 %v70_v50, 7  ;;  %vm2208_vm5 = vcmask 130048  }
   0x3   :  { %v2480_v8 = vpack.c.bf16 %v54_v5, %v52_v2  ;;  %v2992_v9 = vpack.c.bf16 %v221_v7, %v219_v6  ;;  %v218_v10 = vld [vmem:[%s3807_s3] sm:$0xff]  ;;  %v220_v11 = vld [vmem:[%s3807_s3 + $0x10] sm:$0xff]  ;;  %v57_v12 = vld [vmem:[%s3806_s1 + $0x28] sm:$0xff] }
   0x4   :  { %2479 = vmatprep.subr.bf16.mxu0 %v2478_v4  ;;  %v3003_v13 = vpack.c.bf16 %v220_v11, %v218_v10  ;;  %v59_v14 = vld [vmem:[%s3806_s1 + $0x38] sm:$0xff]  ;;  %v56_v15 = vld [vmem:[%s3806_s1 + $0x20] sm:$0xff]  ;;  %v58_v16 = vld [vmem:[%s3806_s1 + $0x30] sm:$0xff]  ;;  %v72_v52 = vsub.s32 0, %v3119_v51  ;;  %v76_v0 = vsub.s32 1, %v3119_v51 }
   0x5   :  { %2481 = vmatpush1.bf16.msra.mxu0 %v2480_v8  ;;  %2495 = vmatprep.subr.bf16.mxu1 %v2992_v9  ;;  %v2482_v17 = vpack.c.bf16 %v59_v14, %v57_v12  ;;  %v2484_v18 = vpack.c.bf16 %v58_v16, %v56_v15  ;;  %v223_v19 = vld [vmem:[%s3807_s3 + $0x28] sm:$0xff]  ;;  %v225_v20 = vld [vmem:[%s3807_s3 + $0x38] sm:$0xff]  ;;  %v222_v21 = vld [vmem:[%s3807_s3 + $0x20] sm:$0xff] }
   0x6   :  { %2497 = vmatpush1.bf16.msra.mxu1 %v3003_v13  ;;  %v3025_v22 = vpack.c.bf16 %v225_v20, %v223_v19  ;;  %v224_v23 = vld [vmem:[%s3807_s3 + $0x30] sm:$0xff]  ;;  %v61_v24 = vld [vmem:[%s3806_s1 + $0x48] sm:$0xff]  ;;  %v63_v25 = vld [vmem:[%s3806_s1 + $0x58] sm:$0xff] }
   0x7   :  { %2483 = vmatprep.subr.bf16.mxu0 %v2482_v17  ;;  %v3036_v26 = vpack.c.bf16 %v224_v23, %v222_v21  ;;  %v2486_v27 = vpack.c.bf16 %v63_v25, %v61_v24  ;;  %v60_v28 = vld [vmem:[%s3806_s1 + $0x40] sm:$0xff]  ;;  %v62_v29 = vld [vmem:[%s3806_s1 + $0x50] sm:$0xff]  ;;  %v227_v30 = vld [vmem:[%s3807_s3 + $0x48] sm:$0xff] }
   0x8   :  { %2499 = vmatprep.subr.bf16.mxu1 %v3025_v22  ;;  %v229_v31 = vld [vmem:[%s3807_s3 + $0x58] sm:$0xff]  ;;  %v226_v32 = vld [vmem:[%s3807_s3 + $0x40] sm:$0xff]  ;;  %v228_v33 = vld [vmem:[%s3807_s3 + $0x50] sm:$0xff]  ;;  %v2488_v34 = vpack.c.bf16 %v62_v29, %v60_v28 }
   0x9   :  { %2485 = vmatpush1.bf16.msra.mxu0 %v2484_v18  ;;  %v3057_v35 = vpack.c.bf16 %v229_v31, %v227_v30  ;;  %v65_v36 = vld [vmem:[%s3806_s1 + $0x68] sm:$0xff]  ;;  %v67_v37 = vld [vmem:[%s3806_s1 + $0x78] sm:$0xff]  ;;  %v64_v38 = vld [vmem:[%s3806_s1 + $0x60] sm:$0xff]  ;;  %v3069_v39 = vpack.c.bf16 %v228_v33, %v226_v32 }
   0xa   :  { %2501 = vmatpush1.bf16.msra.mxu1 %v3036_v26  ;;  %2487 = vmatprep.subr.bf16.mxu0 %v2486_v27  ;;  %v2490_v40 = vpack.c.bf16 %v67_v37, %v65_v36  ;;  %v66_v41 = vld [vmem:[%s3806_s1 + $0x70] sm:$0xff]  ;;  %v231_v42 = vld [vmem:[%s3807_s3 + $0x68] sm:$0xff]  ;;  %v233_v43 = vld [vmem:[%s3807_s3 + $0x78] sm:$0xff] }
   0xb   :  { %2503 = vmatprep.subr.bf16.mxu1 %v3057_v35  ;;  %v3081_v44 = vpack.c.bf16 %v233_v43, %v231_v42  ;;  %v230_v45 = vld [vmem:[%s3807_s3 + $0x60] sm:$0xff]  ;;  %v232_v46 = vld [vmem:[%s3807_s3 + $0x70] sm:$0xff]  ;;  %v2492_v47 = vpack.c.bf16 %v66_v41, %v64_v38  ;;  %v45_v10 = vld [vmem:[%s3808_s0 + $0x8] sm:$0xff] }
   0xc   :  { %v3090_v48 = vpack.c.bf16 %v232_v46, %v230_v45  ;;  %v44_v49 = vld [vmem:[%s3808_s0] sm:$0xff]  ;;  %v47_v36 = vld [vmem:[%s3808_s0 + $0x18] sm:$0xff]  ;;  %v49_v41 = vld [vmem:[%s3808_s0 + $0x28] sm:$0xff] }
   0xd   :  { %2489 = vmatpush1.bf16.msra.mxu0 %v2488_v34  ;;  %v68_v53 = vld [vmem:[%s3809_s2] sm:$0x3]  ;;  %v46_v34 = vld [vmem:[%s3808_s0 + $0x10] sm:$0xff]  ;;  %v51_v43 = vld [vmem:[%s3808_s0 + $0x38] sm:$0xff] }
   0xe   :  { %2505 = vmatpush1.bf16.msra.mxu1 %v3069_v39  ;;  %2491 = vmatprep.subr.bf16.mxu0 %v2490_v40  ;;  %v3127_v54 = vrot.slane %v68_v53, %v72_v52  ;;  %v3134_v1 = vld [vmem:[%s3810_s4] ss:$0 sm:$0xff]  ;;  %v3138_v2 = vrot.slane %v68_v53, %v76_v0  ;;  %s2901_s4 = smov 64   ;;  %v50_v42 = vld [vmem:[%s3808_s0 + $0x30] sm:$0xff] }
   0xf   :  { %2507 = vmatprep.subr.bf16.mxu1 %v3081_v44  ;;  %v48_v37 = vld [vmem:[%s3808_s0 + $0x20] sm:$0xff] }
  0x11   :  { %2493 = vmatpush1.bf16.msra.mxu0 %v2492_v47 }
  0x12   :  { %2509 = vmatpush1.bf16.msra.mxu1 %v3090_v48  ;;  %2527 = vmatprep.subr.bf16.mxu0 %v2992_v9 }
  0x13   :  { %2511 = vmatprep.subr.bf16.mxu1 %v2992_v9 }
  0x14   :  { %2350 = vmatmul.mubr.msk.f32.vlgmr.msra.gmra.mrb[0].mxu0 %vm80_vm0, %v44_v49 }
  0x15   :  { %309 = vmatmul.mubr.f32.vlgmr.msra.gmra.mrb[0].mxu1 %v2900_v3  ;;  %175 = vmatprep.mubr.f32.mxu0 %v2900_v3 }
  0x16   :  { %2513 = vmatpush1.bf16.msra.mxu1 %v3003_v13  ;;  %415 = vmatprep.mubr.f32.mxu1 %v2900_v3 }
  0x17   :  { %2515 = vmatprep.subr.bf16.mxu1 %v3025_v22  ;;  %2529 = vmatpush1.bf16.msra.mxu0 %v3003_v13 }
  0x18   :  { %2531 = vmatprep.subr.bf16.mxu0 %v3025_v22  ;;  %2351 = vmatmul.mubr.msk.f32.gmra.mrb[2].mxu0 %vm80_vm0, %v45_v10 }
  0x19   :  { %181 = vmatprep.mubr.f32.mxu0 %v2900_v3 }
  0x1a   :  { %2517 = vmatpush1.bf16.msra.mxu1 %v3036_v26 }
  0x1b   :  { %2519 = vmatprep.subr.bf16.mxu1 %v3057_v35  ;;  %2533 = vmatpush1.bf16.msra.mxu0 %v3036_v26 }
  0x1c   :  { %2535 = vmatprep.subr.bf16.mxu0 %v3057_v35  ;;  %2352 = vmatmul.mubr.msk.f32.gmra.mrb[4].mxu0 %vm80_vm0, %v46_v34 }
  0x1d   :  { %187 = vmatprep.mubr.f32.mxu0 %v2900_v3 }
  0x1e   :  { %2521 = vmatpush1.bf16.msra.mxu1 %v3069_v39 }
  0x1f   :  { %2523 = vmatprep.subr.bf16.mxu1 %v3081_v44  ;;  %2537 = vmatpush1.bf16.msra.mxu0 %v3069_v39 }
  0x20   :  { %2539 = vmatprep.subr.bf16.mxu0 %v3081_v44  ;;  %2353 = vmatmul.mubr.msk.f32.gmra.mrb[6].mxu0 %vm80_vm0, %v47_v36 }
  0x21   :  { %193 = vmatprep.mubr.f32.mxu0 %v2900_v3 }
  0x22   :  { %2525 = vmatpush1.bf16.msra.mxu1 %v3090_v48 }
  0x23   :  { %2541 = vmatpush1.bf16.msra.mxu0 %v3090_v48  ;;  %2543 = vmatprep.subr.bf16.mxu1 %v2992_v9 }
  0x24   :  { %2559 = vmatprep.subr.bf16.mxu0 %v2992_v9  ;;  %2354 = vmatmul.mubr.msk.f32.gmra.mrb[8].mxu0 %vm80_vm0, %v48_v37 }
  0x25   :  { %199 = vmatprep.mubr.f32.mxu0 %v2900_v3 }
  0x28   :  { %2355 = vmatmul.mubr.msk.f32.gmra.mrb[10].mxu0 %vm80_vm0, %v49_v41 }
  0x29   :  { %205 = vmatprep.mubr.f32.mxu0 %v2900_v3 }
  0x2c   :  { %2356 = vmatmul.mubr.msk.f32.gmra.mrb[12].mxu0 %vm80_vm0, %v50_v42 }
  0x2d   :  { %211 = vmatprep.mubr.f32.mxu0 %v2900_v3 }
  0x30   :  { %2357 = vmatmul.mubr.msk.f32.gmra.mrb[14].mxu0 %vm80_vm0, %v51_v43 }
  0x31   :  { %518 = vmatprep.mubr.f32.mxu0 %v2900_v3 }
  0xe7   :  { %v171_v55 = vpop.f32.mrb[0].mxu0 }
  0xe8   :  { %v172_v56 = vadd.f32 %v171_v55, %v3127_v54  ;;  %v173_v57 = vpop.f32.mrb[1].mxu0  ;;  %v310_v58 = vpop.f32.mrb[0].mxu1 }
  0xe9   :  { %v312_v59 = vpop.f32.mrb[1].mxu1  ;;  %v174_v6 = vadd.f32 %v173_v57, %v3138_v2 }
  0xea   :  { %v315_v60 = vadd.f32 %v310_v58, %v172_v56  ;;  %v322_v4 = vadd.f32 %v3134_v1, %v312_v59 }
  0xeb   :  { %v177_v16 = vpop.f32.mrb[2].mxu0 }
  0xec   :  { %v2359_v61 = vmul.f32 -1.442695, %v315_v60  ;;  %v179_v17 = vpop.f32.mrb[3].mxu0  ;;  %v178_v20 = vadd.f32 %v177_v16, %v3127_v54 }
  0xed   :  { %v180_v31 = vadd.f32 %v179_v17, %v3138_v2 }
  0xee   :  { %2804 = vpow2.f32 %v2359_v61 }
  0xef   :  { %v183_v47 = vpop.f32.mrb[4].mxu0 }
  0xf0   :  { %v185_v49 = vpop.f32.mrb[5].mxu0 }
  0xf1   :  { %v186_v16 = vadd.f32 %v185_v49, %v3138_v2 }
  0xf3   :  { %v189_v50 = vpop.f32.mrb[6].mxu0 }
  0xf4   :  { %v3202_v53 = vpop.f32.mrb[7].mxu0 }
  0xf7   :  { %v3204_v55 = vpop.f32.mrb[8].mxu0 }
  0xf8   :  { %v2805_v62 = vpop.eup %2804  ;;  %v3206_v56 = vpop.f32.mrb[9].mxu0  ;;  %v196_v49 = vadd.f32 %v3204_v55, %v3127_v54 }
  0xf9   :  { %v319_v63 = vadd.f32 1.0, %v2805_v62 }
  0xfb   :  { %2806 = vrcp.f32 %v319_v63  ;;  %v3208_v57 = vpop.f32.mrb[10].mxu0 }
  0xfc   :  { %v3210_v58 = vpop.f32.mrb[11].mxu0 }
  0xff   :  { %v3212_v59 = vpop.f32.mrb[12].mxu0 }
 0x100   :  { %v3214_v60 = vpop.f32.mrb[13].mxu0 }
 0x103   :  { %v3216_v61 = vpop.f32.mrb[14].mxu0 }
 0x104   :  { %v3218_v62 = vpop.f32.mrb[15].mxu0 }
 0x105   :  { %v2807_v5 = vpop.eup %2806 }
 0x106   :  { %v323_v7 = vmul.f32 %v2807_v5, %v322_v4 }
 0x108   :  { %v324_v8 = vadd.f32 %v323_v7, %v174_v6 }
 0x10a   :  { %2808 = vtanh.f32 %v324_v8 }
 0x114   :  { %v2809_v11 = vpop.eup %2808 }
 0x115   :  { %v326_v12 = vsub.f32 0.0, %v2809_v11 }
 0x117   :  { %328 = vrot.lane.b32.xlu0 %v326_v12, %s2901_s4 }
 0x189   :  { %v329_v14 = vpop.permute.xlu0 %328 }
 0x18a   :  { %v331_v15 = vmul.f32 %v2807_v5, %v329_v14  ;;  %v184_v5 = vadd.f32 %v183_v47, %v3127_v54 }
 0x18c   :  { %333 = vrot.lane.b32.xlu0 %v331_v15, %s2901_s4 }
 0x1fe   :  { %v334_v18 = vpop.permute.xlu0 %333 }
 0x1ff   :  { %v3149_v19 = vadd.f32 %v2809_v11, %v334_v18 }
 0x201   :  { %2360 = vmatmul.mubr.msk.f32.vlgmr.msra.gmra.mrb[2].mxu1 %vm80_vm0, %v3149_v19  ;;  %338 = vst.msk [vmem:[#allocation2] sm:$0xff] %vm337_vm1, %v3149_v19 }
 0x202   :  { %340 = vst.msk [vmem:[#allocation2 + $0x38] sm:$0xff] %vm339_vm2, %v3149_v19  ;;  %2545 = vmatpush1.bf16.msra.mxu1 %v3003_v13  ;;  %621 = vmatprep.mubr.f32.mxu1 %v2900_v3 }
 0x203   :  { %2547 = vmatprep.subr.bf16.mxu1 %v3025_v22 }
 0x206   :  { %2549 = vmatpush1.bf16.msra.mxu1 %v3036_v26 }
 0x207   :  { %2551 = vmatprep.subr.bf16.mxu1 %v3057_v35 }
 0x20a   :  { %2553 = vmatpush1.bf16.msra.mxu1 %v3069_v39 }
 0x20b   :  { %2555 = vmatprep.subr.bf16.mxu1 %v3081_v44 }
 0x20e   :  { %2557 = vmatpush1.bf16.msra.mxu1 %v3090_v48 }
 0x20f   :  { %2575 = vmatprep.subr.bf16.mxu1 %v2992_v9 }
 0x2d4   :  { %v417_v21 = vpop.f32.mrb[2].mxu1 }
 0x2d5   :  { %v422_v23 = vadd.f32 %v417_v21, %v178_v20  ;;  %v419_v24 = vpop.f32.mrb[3].mxu1 }
 0x2d6   :  { %v429_v29 = vadd.f32 %v3134_v1, %v419_v24 }
 0x2d7   :  { %v2361_v25 = vmul.f32 -1.442695, %v422_v23 }
 0x2d9   :  { %2810 = vpow2.f32 %v2361_v25 }
 0x2e3   :  { %v2811_v27 = vpop.eup %2810 }
 0x2e4   :  { %v426_v28 = vadd.f32 1.0, %v2811_v27 }
 0x2e6   :  { %2812 = vrcp.f32 %v426_v28  ;;  %v190_v28 = vadd.f32 %v189_v50, %v3127_v54 }
 0x2f0   :  { %v2813_v30 = vpop.eup %2812 }
 0x2f1   :  { %v430_v32 = vmul.f32 %v2813_v30, %v429_v29 }
 0x2f3   :  { %v431_v33 = vadd.f32 %v430_v32, %v180_v31 }
 0x2f5   :  { %2814 = vtanh.f32 %v431_v33 }
 0x2ff   :  { %v2815_v38 = vpop.eup %2814 }
 0x300   :  { %v433_v40 = vsub.f32 %v3149_v19, %v2815_v38 }
 0x302   :  { %435 = vrot.lane.b32.xlu1 %v433_v40, %s2901_s4 }
 0x374   :  { %v436_v45 = vpop.permute.xlu1 %435 }
 0x375   :  { %v438_v46 = vmul.f32 %v2813_v30, %v436_v45 }
 0x377   :  { %440 = vrot.lane.b32.xlu1 %v438_v46, %s2901_s4 }
 0x3e9   :  { %v441_v63 = vpop.permute.xlu1 %440 }
 0x3ea   :  { %v3220_v4 = vadd.f32 %v2815_v38, %v441_v63  ;;  %v192_v38 = vadd.f32 %v3202_v53, %v3138_v2 }
 0x3ec   :  { %2362 = vmatmul.mubr.msk.f32.vlgmr.msra.gmra.mrb[16].mxu0 %vm80_vm0, %v3220_v4  ;;  %444 = vst.msk [vmem:[#allocation2 + $0x8] sm:$0xff] %vm337_vm1, %v3220_v4 }
 0x3ed   :  { %445 = vst.msk [vmem:[#allocation2 + $0x30] sm:$0xff] %vm339_vm2, %v3220_v4  ;;  %2561 = vmatpush1.bf16.msra.mxu0 %v3003_v13  ;;  %724 = vmatprep.mubr.f32.mxu0 %v2900_v3 }
 0x3ee   :  { %2563 = vmatprep.subr.bf16.mxu0 %v3025_v22 }
 0x3f1   :  { %2565 = vmatpush1.bf16.msra.mxu0 %v3036_v26 }
 0x3f2   :  { %2567 = vmatprep.subr.bf16.mxu0 %v3057_v35 }
 0x3f5   :  { %2569 = vmatpush1.bf16.msra.mxu0 %v3069_v39 }
 0x3f6   :  { %2571 = vmatprep.subr.bf16.mxu0 %v3081_v44 }
 0x3f9   :  { %2573 = vmatpush1.bf16.msra.mxu0 %v3090_v48 }
 0x3fa   :  { %2591 = vmatprep.subr.bf16.mxu0 %v2992_v9 }
 0x4bf   :  { %v520_v6 = vpop.f32.mrb[16].mxu0 }
 0x4c0   :  { %v525_v7 = vadd.f32 %v520_v6, %v184_v5  ;;  %v522_v8 = vpop.f32.mrb[17].mxu0 }
 0x4c1   :  { %v532_v14 = vadd.f32 %v3134_v1, %v522_v8 }
 0x4c2   :  { %v2363_v10 = vmul.f32 -1.442695, %v525_v7 }
 0x4c4   :  { %2816 = vpow2.f32 %v2363_v10 }
 0x4ce   :  { %v2817_v11 = vpop.eup %2816 }
 0x4cf   :  { %v529_v12 = vadd.f32 1.0, %v2817_v11  ;;  %v198_v11 = vadd.f32 %v3206_v56, %v3138_v2  ;;  %v202_v56 = vadd.f32 %v3208_v57, %v3127_v54 }
 0x4d1   :  { %2818 = vrcp.f32 %v529_v12 }
 0x4db   :  { %v2819_v15 = vpop.eup %2818 }
 0x4dc   :  { %v533_v17 = vmul.f32 %v2819_v15, %v532_v14 }
 0x4de   :  { %v534_v18 = vadd.f32 %v533_v17, %v186_v16 }
 0x4e0   :  { %2820 = vtanh.f32 %v534_v18 }
 0x4ea   :  { %v2821_v20 = vpop.eup %2820 }
 0x4eb   :  { %v536_v21 = vsub.f32 %v3220_v4, %v2821_v20 }
 0x4ed   :  { %538 = vrot.lane.b32.xlu0 %v536_v21, %s2901_s4 }
 0x55f   :  { %v539_v23 = vpop.permute.xlu0 %538 }
 0x560   :  { %v541_v24 = vmul.f32 %v2819_v15, %v539_v23 }
 0x562   :  { %543 = vrot.lane.b32.xlu1 %v541_v24, %s2901_s4 }
 0x5d4   :  { %v544_v25 = vpop.permute.xlu1 %543 }
 0x5d5   :  { %v3243_v27 = vadd.f32 %v2821_v20, %v544_v25 }
 0x5d7   :  { %2364 = vmatmul.mubr.msk.f32.vlgmr.msra.gmra.mrb[4].mxu1 %vm80_vm0, %v3243_v27  ;;  %547 = vst.msk [vmem:[#allocation2 + $0x10] sm:$0xff] %vm337_vm1, %v3243_v27 }
 0x5d8   :  { %548 = vst.msk [vmem:[#allocation2 + $0x28] sm:$0xff] %vm339_vm2, %v3243_v27  ;;  %2577 = vmatpush1.bf16.msra.mxu1 %v3003_v13  ;;  %827 = vmatprep.mubr.f32.mxu1 %v2900_v3 }
 0x5d9   :  { %2579 = vmatprep.subr.bf16.mxu1 %v3025_v22 }
 0x5dc   :  { %2581 = vmatpush1.bf16.msra.mxu1 %v3036_v26 }
 0x5dd   :  { %2583 = vmatprep.subr.bf16.mxu1 %v3057_v35 }
 0x5e0   :  { %2585 = vmatpush1.bf16.msra.mxu1 %v3069_v39 }
 0x5e1   :  { %2587 = vmatprep.subr.bf16.mxu1 %v3081_v44 }
 0x5e4   :  { %2589 = vmatpush1.bf16.msra.mxu1 %v3090_v48 }
 0x5e5   :  { %2607 = vmatprep.subr.bf16.mxu1 %v2992_v9 }
 0x6aa   :  { %v623_v29 = vpop.f32.mrb[4].mxu1 }
 0x6ab   :  { %v628_v30 = vadd.f32 %v623_v29, %v190_v28  ;;  %v625_v31 = vpop.f32.mrb[5].mxu1 }
 0x6ac   :  { %v635_v36 = vadd.f32 %v3134_v1, %v625_v31 }
 0x6ad   :  { %v2365_v32 = vmul.f32 -1.442695, %v628_v30 }
 0x6af   :  { %2822 = vpow2.f32 %v2365_v32 }
 0x6b9   :  { %v2823_v33 = vpop.eup %2822 }
 0x6ba   :  { %v632_v34 = vadd.f32 1.0, %v2823_v33 }
 0x6bc   :  { %2824 = vrcp.f32 %v632_v34 }
 0x6c6   :  { %v2825_v37 = vpop.eup %2824 }
 0x6c7   :  { %v636_v40 = vmul.f32 %v2825_v37, %v635_v36 }
 0x6c9   :  { %v637_v41 = vadd.f32 %v636_v40, %v192_v38 }
 0x6cb   :  { %2826 = vtanh.f32 %v637_v41 }
 0x6d5   :  { %v2827_v9 = vpop.eup %2826 }
 0x6d6   :  { %v639_v42 = vsub.f32 %v3243_v27, %v2827_v9 }
 0x6d8   :  { %641 = vrot.lane.b32.xlu0 %v639_v42, %s2901_s4  ;;  %v210_v42 = vadd.f32 %v3214_v60, %v3138_v2  ;;  %v214_v60 = vadd.f32 %v3216_v61, %v3127_v54  ;;  %v1078_v61 = vld [vmem:[%s3811_s5] sm:$0xff] }
 0x74a   :  { %v642_v43 = vpop.permute.xlu0 %641 }
 0x74b   :  { %v644_v45 = vmul.f32 %v2825_v37, %v642_v43 }
 0x74d   :  { %646 = vrot.lane.b32.xlu1 %v644_v45, %s2901_s4 }
 0x7bf   :  { %v647_v46 = vpop.permute.xlu1 %646 }
 0x7c0   :  { %v3267_v47 = vadd.f32 %v2827_v9, %v647_v46 }
 0x7c2   :  { %2366 = vmatmul.mubr.msk.f32.vlgmr.msra.gmra.mrb[18].mxu0 %vm80_vm0, %v3267_v47  ;;  %650 = vst.msk [vmem:[#allocation2 + $0x18] sm:$0xff] %vm337_vm1, %v3267_v47 }
 0x7c3   :  { %651 = vst.msk [vmem:[#allocation2 + $0x20] sm:$0xff] %vm339_vm2, %v3267_v47  ;;  %2593 = vmatpush1.bf16.msra.mxu0 %v3003_v13  ;;  %930 = vmatprep.mubr.f32.mxu0 %v2900_v3 }
 0x7c4   :  { %2595 = vmatprep.subr.bf16.mxu0 %v3025_v22 }
 0x7c7   :  { %2597 = vmatpush1.bf16.msra.mxu0 %v3036_v26 }
 0x7c8   :  { %2599 = vmatprep.subr.bf16.mxu0 %v3057_v35 }
 0x7cb   :  { %2601 = vmatpush1.bf16.msra.mxu0 %v3069_v39 }
 0x7cc   :  { %2603 = vmatprep.subr.bf16.mxu0 %v3081_v44 }
 0x7cf   :  { %2605 = vmatpush1.bf16.msra.mxu0 %v3090_v48 }
 0x895   :  { %v726_v50 = vpop.f32.mrb[18].mxu0 }
 0x896   :  { %v731_v53 = vadd.f32 %v726_v50, %v196_v49  ;;  %v728_v63 = vpop.f32.mrb[19].mxu0 }
 0x897   :  { %v738_v8 = vadd.f32 %v3134_v1, %v728_v63 }
 0x898   :  { %v2367_v5 = vmul.f32 -1.442695, %v731_v53 }
 0x89a   :  { %2828 = vpow2.f32 %v2367_v5 }
 0x8a4   :  { %v2829_v6 = vpop.eup %2828 }
 0x8a5   :  { %v735_v7 = vadd.f32 1.0, %v2829_v6 }
 0x8a7   :  { %2830 = vrcp.f32 %v735_v7 }
 0x8b1   :  { %v2831_v10 = vpop.eup %2830 }
 0x8b2   :  { %v739_v12 = vmul.f32 %v2831_v10, %v738_v8 }
 0x8b4   :  { %v740_v14 = vadd.f32 %v739_v12, %v198_v11 }
 0x8b6   :  { %2832 = vtanh.f32 %v740_v14 }
 0x8c0   :  { %v2833_v15 = vpop.eup %2832 }
 0x8c1   :  { %v742_v55 = vsub.f32 %v3267_v47, %v2833_v15 }
 0x8c3   :  { %744 = vrot.lane.b32.xlu0 %v742_v55, %s2901_s4 }
 0x935   :  { %v745_v16 = vpop.permute.xlu0 %744 }
 0x936   :  { %v747_v17 = vmul.f32 %v2831_v10, %v745_v16 }
 0x938   :  { %749 = vrot.lane.b32.xlu1 %v747_v17, %s2901_s4 }
 0x9aa   :  { %v750_v18 = vpop.permute.xlu1 %749 }
 0x9ab   :  { %v3291_v20 = vadd.f32 %v2833_v15, %v750_v18  ;;  %v216_v15 = vadd.f32 %v3218_v62, %v3138_v2  ;;  %v1080_v18 = vld [vmem:[%s3811_s5 + $0x10] sm:$0xff] }
 0x9ad   :  { %2368 = vmatmul.mubr.msk.f32.vlgmr.msra.gmra.mrb[6].mxu1 %vm80_vm0, %v3291_v20 }
 0x9ae   :  { %2609 = vmatpush1.bf16.msra.mxu1 %v3003_v13  ;;  %1033 = vmatprep.mubr.f32.mxu1 %v2900_v3 }
 0x9af   :  { %2611 = vmatprep.subr.bf16.mxu1 %v3025_v22 }
 0x9b2   :  { %2613 = vmatpush1.bf16.msra.mxu1 %v3036_v26 }
 0x9b3   :  { %2615 = vmatprep.subr.bf16.mxu1 %v3057_v35 }
 0x9b6   :  { %2617 = vmatpush1.bf16.msra.mxu1 %v3069_v39  ;;  %v204_v39 = vadd.f32 %v3210_v58, %v3138_v2  ;;  %v208_v58 = vadd.f32 %v3212_v59, %v3127_v54  ;;  %v1081_v2 = vld [vmem:[%s3811_s5 + $0x18] sm:$0xff] }
 0x9b7   :  { %2619 = vmatprep.subr.bf16.mxu1 %v3081_v44 }
 0x9ba   :  { %2621 = vmatpush1.bf16.msra.mxu1 %v3090_v48 }
 0xa80   :  { %v829_v21 = vpop.f32.mrb[6].mxu1 }
 0xa81   :  { %v834_v23 = vadd.f32 %v829_v21, %v202_v56  ;;  %v831_v13 = vpop.f32.mrb[7].mxu1  ;;  %v1085_v56 = vld [vmem:[%s3811_s5 + $0x38] sm:$0xff]  ;;  %v2624_v21 = vpack.c.bf16 %v1080_v18, %v1078_v61  ;;  %v1104_v61 = vld [vmem:[%s3811_s5 + $0xd0] sm:$0xff] }
 0xa82   :  { %v841_v26 = vadd.f32 %v3134_v1, %v831_v13  ;;  %v1082_v13 = vld [vmem:[%s3811_s5 + $0x20] sm:$0xff] }
 0xa83   :  { %v2369_v24 = vmul.f32 -1.442695, %v834_v23 }
 0xa85   :  { %2834 = vpow2.f32 %v2369_v24  ;;  %v1084_v24 = vld [vmem:[%s3811_s5 + $0x30] sm:$0xff] }
 0xa8f   :  { %v2835_v25 = vpop.eup %2834 }
 0xa90   :  { %v838_v22 = vadd.f32 1.0, %v2835_v25  ;;  %v1087_v25 = vld [vmem:[%s3811_s5 + $0x48] sm:$0xff] }
 0xa92   :  { %2836 = vrcp.f32 %v838_v22 }
 0xa9c   :  { %v2837_v35 = vpop.eup %2836 }
 0xa9d   :  { %v842_v44 = vmul.f32 %v2837_v35, %v841_v26  ;;  %v1089_v26 = vld [vmem:[%s3811_s5 + $0x58] sm:$0xff] }
 0xa9f   :  { %v843_v28 = vadd.f32 %v842_v44, %v204_v39  ;;  %v2628_v39 = vpack.c.bf16 %v1084_v24, %v1082_v13  ;;  %v2630_v44 = vpack.c.bf16 %v1089_v26, %v1087_v25  ;;  %v1107_v24 = vld [vmem:[%s3811_s5 + $0xe8] sm:$0xff]  ;;  %v1109_v25 = vld [vmem:[%s3811_s5 + $0xf8] sm:$0xff]  ;;  %v1106_v26 = vld [vmem:[%s3811_s5 + $0xe0] sm:$0xff] }
 0xaa1   :  { %2838 = vtanh.f32 %v843_v28  ;;  %v1086_v28 = vld [vmem:[%s3811_s5 + $0x40] sm:$0xff] }
 0xaab   :  { %v2839_v48 = vpop.eup %2838 }
 0xaac   :  { %v845_v57 = vsub.f32 %v3291_v20, %v2839_v48 }
 0xaae   :  { %847 = vrot.lane.b32.xlu0 %v845_v57, %s2901_s4  ;;  %v1091_v57 = vld [vmem:[%s3811_s5 + $0x68] sm:$0xff] }
 0xb20   :  { %v848_v29 = vpop.permute.xlu0 %847 }
 0xb21   :  { %v850_v30 = vmul.f32 %v2837_v35, %v848_v29  ;;  %v1093_v29 = vld [vmem:[%s3811_s5 + $0x78] sm:$0xff] }
 0xb23   :  { %852 = vrot.lane.b32.xlu1 %v850_v30, %s2901_s4  ;;  %v1236_v30 = vld [vmem:[%s3812_s7 + $0x8] sm:$0xff] }
 0xb95   :  { %v853_v31 = vpop.permute.xlu1 %852 }
 0xb96   :  { %v3311_v32 = vadd.f32 %v2839_v48, %v853_v31  ;;  %v1088_v48 = vld [vmem:[%s3811_s5 + $0x50] sm:$0xff] }
 0xb98   :  { %2370 = vmatmul.mubr.msk.f32.vlgmr.msra.gmra.mrb[20].mxu0 %vm80_vm0, %v3311_v32 }
 0xb99   :  { %1186 = vmatprep.mubr.f32.mxu0 %v2900_v3 }
 0xc6b   :  { %v932_v33 = vpop.f32.mrb[20].mxu0 }
 0xc6c   :  { %v937_v34 = vadd.f32 %v932_v33, %v208_v58  ;;  %v934_v36 = vpop.f32.mrb[21].mxu0  ;;  %v1238_v58 = vld [vmem:[%s3812_s7 + $0x18] sm:$0xff]  ;;  %v1235_v33 = vld [vmem:[%s3812_s7] sm:$0xff] }
 0xc6d   :  { %v944_v41 = vadd.f32 %v3134_v1, %v934_v36  ;;  %v2632_v36 = vpack.c.bf16 %v1088_v48, %v1086_v28  ;;  %v1250_v28 = vld [vmem:[%s3812_s7 + $0x78] sm:$0xff]  ;;  %v1247_v48 = vld [vmem:[%s3812_s7 + $0x60] sm:$0xff] }
 0xc6e   :  { %v2371_v37 = vmul.f32 -1.442695, %v937_v34  ;;  %v1237_v34 = vld [vmem:[%s3812_s7 + $0x10] sm:$0xff] }
 0xc70   :  { %2840 = vpow2.f32 %v2371_v37  ;;  %v1090_v37 = vld [vmem:[%s3811_s5 + $0x60] sm:$0xff] }
 0xc7a   :  { %v2841_v38 = vpop.eup %2840 }
 0xc7b   :  { %v941_v40 = vadd.f32 1.0, %v2841_v38  ;;  %v1092_v38 = vld [vmem:[%s3811_s5 + $0x70] sm:$0xff] }
 0xc7d   :  { %2842 = vrcp.f32 %v941_v40  ;;  %v3404_v40 = vpack.c.bf16 %v1238_v58, %v1236_v30 }
 0xc7f   :  { %2655 = vmatprep.subr.bf16.mxu1 %v3404_v40 }
 0xc87   :  { %v2843_v9 = vpop.eup %2842 }
 0xc88   :  { %v945_v43 = vmul.f32 %v2843_v9, %v944_v41  ;;  %v3406_v41 = vpack.c.bf16 %v1237_v34, %v1235_v33 }
 0xc8a   :  { %v946_v45 = vadd.f32 %v945_v43, %v210_v42  ;;  %v1095_v42 = vld [vmem:[%s3811_s5 + $0x88] sm:$0xff] }
 0xc8b   :  { %v1240_v43 = vld [vmem:[%s3812_s7 + $0x28] sm:$0xff] }
 0xc8c   :  { %2844 = vtanh.f32 %v946_v45  ;;  %v1242_v45 = vld [vmem:[%s3812_s7 + $0x38] sm:$0xff] }
 0xc96   :  { %v2845_v46 = vpop.eup %2844 }
 0xc97   :  { %v948_v59 = vsub.f32 %v3311_v32, %v2845_v46 }
 0xc99   :  { %950 = vrot.lane.b32.xlu0 %v948_v59, %s2901_s4  ;;  %v3421_v59 = vpack.c.bf16 %v1242_v45, %v1240_v43 }
 0xd0b   :  { %v951_v49 = vpop.permute.xlu0 %950 }
 0xd0c   :  { %v953_v50 = vmul.f32 %v2843_v9, %v951_v49  ;;  %v2634_v9 = vpack.c.bf16 %v1093_v29, %v1091_v57  ;;  %v1239_v49 = vld [vmem:[%s3812_s7 + $0x20] sm:$0xff]  ;;  %v1249_v57 = vld [vmem:[%s3812_s7 + $0x70] sm:$0xff] }
 0xd0d   :  { %v3508_v30 = vpack.c.bf16 %v1249_v57, %v1247_v48 }
 0xd0e   :  { %955 = vrot.lane.b32.xlu1 %v953_v50, %s2901_s4  ;;  %v1241_v50 = vld [vmem:[%s3812_s7 + $0x30] sm:$0xff] }
 0xd80   :  { %v956_v53 = vpop.permute.xlu1 %955 }
 0xd81   :  { %v3324_v63 = vadd.f32 %v2845_v46, %v956_v53  ;;  %v1097_v46 = vld [vmem:[%s3811_s5 + $0x98] sm:$0xff]  ;;  %v3430_v53 = vpack.c.bf16 %v1241_v50, %v1239_v49 }
 0xd83   :  { %2372 = vmatmul.mubr.msk.f32.vlgmr.msra.gmra.mrb[8].mxu1 %vm80_vm0, %v3324_v63 }
 0xd84   :  { %1322 = vmatprep.mubr.f32.mxu1 %v2900_v3  ;;  %2657 = vmatpush1.bf16.msra.mxu1 %v3406_v41 }
 0xd85   :  { %2659 = vmatprep.subr.bf16.mxu1 %v3421_v59 }
 0xd88   :  { %2661 = vmatpush1.bf16.msra.mxu1 %v3430_v53 }
 0xe56   :  { %v1035_v5 = vpop.f32.mrb[8].mxu1 }
 0xe57   :  { %v1040_v6 = vadd.f32 %v1035_v5, %v214_v60  ;;  %v1037_v7 = vpop.f32.mrb[9].mxu1  ;;  %v2636_v60 = vpack.c.bf16 %v1092_v38, %v1090_v37  ;;  %v2638_v5 = vpack.c.bf16 %v1097_v46, %v1095_v42  ;;  %v1110_v37 = vld [vmem:[%s3813_s6] sm:$0x3] }
 0xe58   :  { %v1047_v12 = vadd.f32 %v3134_v1, %v1037_v7  ;;  %v1079_v1 = vld [vmem:[%s3811_s5 + $0x8] sm:$0xff]  ;;  %v1096_v7 = vld [vmem:[%s3811_s5 + $0x90] sm:$0xff]  ;;  %v3552_v38 = vrot.slane %v1110_v37, %v72_v52 }
 0xe59   :  { %v2373_v8 = vmul.f32 -1.442695, %v1040_v6  ;;  %v2622_v62 = vpack.c.bf16 %v1081_v2, %v1079_v1  ;;  %v1094_v6 = vld [vmem:[%s3811_s5 + $0x80] sm:$0xff] }
 0xe5a   :  { %v1102_v2 = vld [vmem:[%s3811_s5 + $0xc0] sm:$0xff] }
 0xe5b   :  { %2846 = vpow2.f32 %v2373_v8  ;;  %2623 = vmatprep.subr.bf16.mxu0 %v2622_v62  ;;  %v1099_v8 = vld [vmem:[%s3811_s5 + $0xa8] sm:$0xff]  ;;  %v2648_v18 = vpack.c.bf16 %v1104_v61, %v1102_v2 }
 0xe5c   :  { %2625 = vmatpush1.bf16.msra.mxu0 %v2624_v21  ;;  %v1244_v62 = vld [vmem:[%s3812_s7 + $0x48] sm:$0xff]  ;;  %v1245_v21 = vld [vmem:[%s3812_s7 + $0x50] sm:$0xff] }
 0xe65   :  { %v2847_v10 = vpop.eup %2846 }
 0xe66   :  { %v1044_v11 = vadd.f32 1.0, %v2847_v10  ;;  %v1101_v10 = vld [vmem:[%s3811_s5 + $0xb8] sm:$0xff] }
 0xe68   :  { %2848 = vrcp.f32 %v1044_v11  ;;  %v2640_v11 = vpack.c.bf16 %v1096_v7, %v1094_v6 }
 0xe72   :  { %v2849_v14 = vpop.eup %2848 }
 0xe73   :  { %v1048_v55 = vmul.f32 %v2849_v14, %v1047_v12  ;;  %v2642_v12 = vpack.c.bf16 %v1101_v10, %v1099_v8 }
 0xe75   :  { %v1049_v16 = vadd.f32 %v1048_v55, %v216_v15  ;;  %v1100_v15 = vld [vmem:[%s3811_s5 + $0xb0] sm:$0xff] }
 0xe77   :  { %2850 = vtanh.f32 %v1049_v16  ;;  %v1103_v16 = vld [vmem:[%s3811_s5 + $0xc8] sm:$0xff] }
 0xe81   :  { %v3334_v17 = vpop.eup %2850 }
 0xe82   :  { %v1051_v54 = vsub.f32 %v3324_v63, %v3334_v17 }
 0xe84   :  { %1053 = vrot.lane.b32.xlu0 %v1051_v54, %s2901_s4  ;;  %v1105_v54 = vld [vmem:[%s3811_s5 + $0xd8] sm:$0xff] }
 0xe85   :  { %v2646_v1 = vpack.c.bf16 %v1105_v54, %v1103_v16 }
 0xe88   :  { %342 = vrot.lane.b32.xlu0 %v3149_v19, %s2901_s4  ;;  %v1083_v19 = vld [vmem:[%s3811_s5 + $0x28] sm:$0xff] }
 0xe89   :  { %v2626_v23 = vpack.c.bf16 %v1085_v56, %v1083_v19  ;;  %v1246_v19 = vld [vmem:[%s3812_s7 + $0x58] sm:$0xff]  ;;  %v1243_v56 = vld [vmem:[%s3812_s7 + $0x40] sm:$0xff] }
 0xe8a   :  { %v3478_v13 = vpack.c.bf16 %v1245_v21, %v1243_v56 }
 0xe8b   :  { %2627 = vmatprep.subr.bf16.mxu0 %v2626_v23  ;;  %v3476_v23 = vpack.c.bf16 %v1246_v19, %v1244_v62 }
 0xe8c   :  { %2629 = vmatpush1.bf16.msra.mxu0 %v2628_v39  ;;  %v1248_v39 = vld [vmem:[%s3812_s7 + $0x68] sm:$0xff] }
 0xe8d   :  { %2631 = vmatprep.subr.bf16.mxu0 %v2630_v44  ;;  %2663 = vmatprep.subr.bf16.mxu1 %v3476_v23  ;;  %v3506_v29 = vpack.c.bf16 %v1250_v28, %v1248_v39 }
 0xe8e   :  { %2665 = vmatpush1.bf16.msra.mxu1 %v3478_v13 }
 0xe8f   :  { %2667 = vmatprep.subr.bf16.mxu1 %v3506_v29 }
 0xe90   :  { %2633 = vmatpush1.bf16.msra.mxu0 %v2632_v36 }
 0xe91   :  { %2635 = vmatprep.subr.bf16.mxu0 %v2634_v9 }
 0xe92   :  { %2669 = vmatpush1.bf16.msra.mxu1 %v3508_v30 }
 0xe93   :  { %2671 = vmatprep.subr.bf16.mxu1 %v3404_v40 }
 0xe94   :  { %2637 = vmatpush1.bf16.msra.mxu0 %v2636_v60  ;;  %v3558_v60 = vld [vmem:[%s3814_s8] ss:$0 sm:$0xff] }
 0xe95   :  { %2639 = vmatprep.subr.bf16.mxu0 %v2638_v5  ;;  %1323 = vmatmul.mubr.f32.vlgmr.msra.gmra.mrb[10].mxu1 %v2900_v3  ;;  %v3562_v5 = vrot.slane %v1110_v37, %v76_v0 }
 0xe96   :  { %2673 = vmatpush1.bf16.msra.mxu1 %v3406_v41  ;;  %1420 = vmatprep.mubr.f32.mxu1 %v2900_v3 }
 0xe97   :  { %2675 = vmatprep.subr.bf16.mxu1 %v3421_v59 }
 0xe98   :  { %2641 = vmatpush1.bf16.msra.mxu0 %v2640_v11 }
 0xe99   :  { %2643 = vmatprep.subr.bf16.mxu0 %v2642_v12 }
 0xe9a   :  { %2677 = vmatpush1.bf16.msra.mxu1 %v3430_v53 }
 0xe9b   :  { %2679 = vmatprep.subr.bf16.mxu1 %v3476_v23 }
 0xe9e   :  { %2681 = vmatpush1.bf16.msra.mxu1 %v3478_v13 }
 0xe9f   :  { %2683 = vmatprep.subr.bf16.mxu1 %v3506_v29 }
 0xea2   :  { %2685 = vmatpush1.bf16.msra.mxu1 %v3508_v30 }
 0xea3   :  { %2687 = vmatprep.subr.bf16.mxu1 %v3404_v40 }
 0xef6   :  { %v1054_v22 = vpop.permute.xlu0 %1053 }
 0xef7   :  { %v1056_v35 = vmul.f32 %v2849_v14, %v1054_v22  ;;  %v1098_v14 = vld [vmem:[%s3811_s5 + $0xa0] sm:$0xff]  ;;  %v2650_v22 = vpack.c.bf16 %v1109_v25, %v1107_v24 }
 0xef8   :  { %v2644_v55 = vpack.c.bf16 %v1100_v15, %v1098_v14 }
 0xef9   :  { %1058 = vrot.lane.b32.xlu1 %v1056_v35, %s2901_s4  ;;  %v1108_v35 = vld [vmem:[%s3811_s5 + $0xf0] sm:$0xff] }
 0xefa   :  { %v343_v31 = vpop.permute.xlu0 %342  ;;  %2645 = vmatpush1.bf16.msra.mxu0 %v2644_v55  ;;  %v2652_v44 = vpack.c.bf16 %v1108_v35, %v1106_v26 }
 0xefb   :  { %346 = vst.msk [vmem:[#allocation2 + $0x38] sm:$0xff] %vm345_vm3, %v343_v31  ;;  %2647 = vmatprep.subr.bf16.mxu0 %v2646_v1 }
 0xefc   :  { %348 = vst.msk [vmem:[#allocation2] sm:$0xff] %vm347_vm4, %v343_v31 }
 0xefe   :  { %2649 = vmatpush1.bf16.msra.mxu0 %v2648_v18 }
 0xeff   :  { %2651 = vmatprep.subr.bf16.mxu0 %v2650_v22 }
 0xf02   :  { %2653 = vmatpush1.bf16.msra.mxu0 %v2652_v44 }
 0xf03   :  { %2703 = vmatprep.subr.bf16.mxu0 %v3404_v40 }
 0xf68   :  { %v1324_v34 = vpop.f32.mrb[10].mxu1 }
 0xf69   :  { %v1326_v36 = vpop.f32.mrb[11].mxu1 }
 0xf6a   :  { %v1336_v52 = vadd.f32 %v3558_v60, %v1326_v36 }
 0xf6b   :  { %v1059_v31 = vpop.permute.xlu1 %1058 }
 0xf6c   :  { %v1061_v58 = vadd.f32 %v3334_v17, %v1059_v31 }
 0xf6e   :  { %1062 = vst.msk [vmem:[#allocation2 + $0x38] sm:$0xff] %vm337_vm1, %v1061_v58  ;;  %1065 = vrot.lane.b32.xlu1 %v1061_v58, %s2901_s4 }
 0xf6f   :  { %1063 = vst.msk [vmem:[#allocation2] sm:$0xff] %vm339_vm2, %v1061_v58 }
 0xf72   :  { %447 = vrot.lane.b32.xlu1 %v3220_v4, %s2901_s4 }
 0xfe0   :  { %v1066_v17 = vpop.permute.xlu1 %1065 }
 0xfe1   :  { %1068 = vst.msk [vmem:[#allocation2] sm:$0xff] %vm345_vm3, %v1066_v17 }
 0xfe2   :  { %1069 = vst.msk [vmem:[#allocation2 + $0x38] sm:$0xff] %vm347_vm4, %v1066_v17 }
 0xfe4   :  { %v448_v33 = vpop.permute.xlu1 %447 }
 0xfe5   :  { %450 = vst.msk [vmem:[#allocation2 + $0x30] sm:$0xff] %vm345_vm3, %v448_v33 }
 0xfe6   :  { %451 = vst.msk [vmem:[#allocation2 + $0x8] sm:$0xff] %vm347_vm4, %v448_v33 }
 0xfe7   :  { %959 = vst.msk [vmem:[#allocation2 + $0x30] sm:$0xff] %vm337_vm1, %v3324_v63 }
 0xfe8   :  { %960 = vst.msk [vmem:[#allocation2 + $0x8] sm:$0xff] %vm339_vm2, %v3324_v63  ;;  %v1070_v4 = vld [vmem:[#allocation2] sm:$0xff] }
 0xfe9   :  { %1187 = vmatmul.mubr.f32.vlgmr.msra.gmra.mrb[22].mxu0 %v1070_v4 }
 0xfea   :  { %1192 = vmatprep.mubr.f32.mxu0 %v2900_v3  ;;  %2705 = vmatpush1.bf16.msra.mxu0 %v3406_v41 }
 0xfeb   :  { %2707 = vmatprep.subr.bf16.mxu0 %v3421_v59 }
 0xfee   :  { %2709 = vmatpush1.bf16.msra.mxu0 %v3430_v53 }
 0xfef   :  { %2711 = vmatprep.subr.bf16.mxu0 %v3476_v23 }
 0xff2   :  { %2713 = vmatpush1.bf16.msra.mxu0 %v3478_v13 }
 0xff3   :  { %2715 = vmatprep.subr.bf16.mxu0 %v3506_v29 }
 0xff6   :  { %2717 = vmatpush1.bf16.msra.mxu0 %v3508_v30 }
 0xff7   :  { %2735 = vmatprep.subr.bf16.mxu0 %v3404_v40 }
0x10bc   :  { %v1188_v9 = vpop.f32.mrb[22].mxu0 }
0x10bd   :  { %v1189_v42 = vadd.f32 %v1188_v9, %v3552_v38  ;;  %v1190_v43 = vpop.f32.mrb[23].mxu0 }
0x10be   :  { %v1191_v7 = vadd.f32 %v1190_v43, %v3562_v5 }
0x10bf   :  { %v1329_v45 = vadd.f32 %v1324_v34, %v1189_v42 }
0x10c1   :  { %v2375_v46 = vmul.f32 -1.442695, %v1329_v45 }
0x10c3   :  { %2852 = vpow2.f32 %v2375_v46 }
0x10cd   :  { %v2853_v49 = vpop.eup %2852 }
0x10ce   :  { %v1333_v50 = vadd.f32 1.0, %v2853_v49 }
0x10d0   :  { %2854 = vrcp.f32 %v1333_v50 }
0x10da   :  { %v2855_v6 = vpop.eup %2854 }
0x10db   :  { %v1337_v8 = vmul.f32 %v2855_v6, %v1336_v52 }
0x10dd   :  { %v1338_v10 = vadd.f32 %v1337_v8, %v1191_v7 }
0x10df   :  { %2856 = vtanh.f32 %v1338_v10 }
0x10e9   :  { %v2857_v11 = vpop.eup %2856 }
0x10ea   :  { %v1340_v12 = vsub.f32 0.0, %v2857_v11 }
0x10ec   :  { %1342 = vrot.lane.b32.xlu0 %v1340_v12, %s2901_s4 }
0x10f0   :  { %962 = vrot.lane.b32.xlu0 %v3324_v63, %s2901_s4 }
0x115e   :  { %v1343_v14 = vpop.permute.xlu0 %1342 }
0x115f   :  { %v1345_v15 = vmul.f32 %v2855_v6, %v1343_v14 }
0x1161   :  { %1347 = vrot.lane.b32.xlu1 %v1345_v15, %s2901_s4  ;;  %v1077_v15 = vld [vmem:[#allocation2 + $0x38] sm:$0xff] }
0x1162   :  { %v963_v51 = vpop.permute.xlu0 %962 }
0x1163   :  { %965 = vst.msk [vmem:[#allocation2 + $0x8] sm:$0xff] %vm345_vm3, %v963_v51 }
0x1164   :  { %966 = vst.msk [vmem:[#allocation2 + $0x30] sm:$0xff] %vm347_vm4, %v963_v51 }
0x1165   :  { %550 = vrot.lane.b32.xlu1 %v3243_v27, %s2901_s4 }
0x116a   :  { %v1071_v0 = vld [vmem:[#allocation2 + $0x8] sm:$0xff] }
0x116b   :  { %1193 = vmatmul.mubr.f32.gmra.mrb[24].mxu0 %v1071_v0 }
0x116c   :  { %1198 = vmatprep.mubr.f32.mxu0 %v2900_v3 }
0x11d3   :  { %v1348_v55 = vpop.permute.xlu1 %1347 }
0x11d4   :  { %v1350_v16 = vadd.f32 %v2857_v11, %v1348_v55 }
0x11d6   :  { %1351 = vst.msk [vmem:[#allocation3] sm:$0xff] %vm337_vm1, %v1350_v16  ;;  %2376 = vmatmul.mubr.msk.f32.vlgmr.msra.gmra.mrb[12].mxu1 %vm80_vm0, %v1350_v16 }
0x11d7   :  { %1352 = vst.msk [vmem:[#allocation3 + $0x38] sm:$0xff] %vm339_vm2, %v1350_v16  ;;  %v551_v63 = vpop.permute.xlu1 %550  ;;  %2689 = vmatpush1.bf16.msra.mxu1 %v3406_v41  ;;  %1518 = vmatprep.mubr.f32.mxu1 %v2900_v3 }
0x11d8   :  { %553 = vst.msk [vmem:[#allocation2 + $0x28] sm:$0xff] %vm345_vm3, %v551_v63  ;;  %2691 = vmatprep.subr.bf16.mxu1 %v3421_v59 }
0x11d9   :  { %554 = vst.msk [vmem:[#allocation2 + $0x10] sm:$0xff] %vm347_vm4, %v551_v63 }
0x11da   :  { %856 = vst.msk [vmem:[#allocation2 + $0x28] sm:$0xff] %vm337_vm1, %v3311_v32 }
0x11db   :  { %857 = vst.msk [vmem:[#allocation2 + $0x10] sm:$0xff] %vm339_vm2, %v3311_v32  ;;  %2693 = vmatpush1.bf16.msra.mxu1 %v3430_v53 }
0x11dc   :  { %2695 = vmatprep.subr.bf16.mxu1 %v3476_v23 }
0x11df   :  { %2697 = vmatpush1.bf16.msra.mxu1 %v3478_v13 }
0x11e0   :  { %2699 = vmatprep.subr.bf16.mxu1 %v3506_v29 }
0x11e3   :  { %2701 = vmatpush1.bf16.msra.mxu1 %v3508_v30 }
0x11e4   :  { %2719 = vmatprep.subr.bf16.mxu1 %v3404_v40 }
0x123e   :  { %v1194_v27 = vpop.f32.mrb[24].mxu0 }
0x123f   :  { %v1196_v54 = vpop.f32.mrb[25].mxu0  ;;  %v1195_v1 = vadd.f32 %v1194_v27, %v3552_v38 }
0x1240   :  { %v1197_v25 = vadd.f32 %v1196_v54, %v3562_v5 }
0x12a9   :  { %v1422_v2 = vpop.f32.mrb[12].mxu1 }
0x12aa   :  { %v1427_v61 = vadd.f32 %v1422_v2, %v1195_v1  ;;  %v1424_v62 = vpop.f32.mrb[13].mxu1 }
0x12ab   :  { %v1434_v21 = vadd.f32 %v3558_v60, %v1424_v62 }
0x12ac   :  { %v2377_v18 = vmul.f32 -1.442695, %v1427_v61 }
0x12ae   :  { %2858 = vpow2.f32 %v2377_v18 }
0x12b8   :  { %v2859_v19 = vpop.eup %2858 }
0x12b9   :  { %v1431_v56 = vadd.f32 1.0, %v2859_v19 }
0x12bb   :  { %2860 = vrcp.f32 %v1431_v56 }
0x12c5   :  { %v2861_v24 = vpop.eup %2860 }
0x12c6   :  { %v1435_v22 = vmul.f32 %v2861_v24, %v1434_v21 }
0x12c8   :  { %v1436_v26 = vadd.f32 %v1435_v22, %v1197_v25 }
0x12ca   :  { %2862 = vtanh.f32 %v1436_v26 }
0x12d4   :  { %v2863_v35 = vpop.eup %2862 }
0x12d5   :  { %v1438_v39 = vsub.f32 %v1350_v16, %v2863_v35 }
0x12d7   :  { %1440 = vrot.lane.b32.xlu0 %v1438_v39, %s2901_s4 }
0x12db   :  { %859 = vrot.lane.b32.xlu0 %v3311_v32, %s2901_s4 }
0x1349   :  { %v1441_v44 = vpop.permute.xlu0 %1440 }
0x134a   :  { %v1443_v28 = vmul.f32 %v2861_v24, %v1441_v44 }
0x134c   :  { %1445 = vrot.lane.b32.xlu1 %v1443_v28, %s2901_s4 }
0x134d   :  { %v860_v48 = vpop.permute.xlu0 %859 }
0x134e   :  { %862 = vst.msk [vmem:[#allocation2 + $0x10] sm:$0xff] %vm345_vm3, %v860_v48 }
0x134f   :  { %863 = vst.msk [vmem:[#allocation2 + $0x28] sm:$0xff] %vm347_vm4, %v860_v48 }
0x1350   :  { %653 = vrot.lane.b32.xlu1 %v3267_v47, %s2901_s4 }
0x1355   :  { %v1072_v57 = vld [vmem:[#allocation2 + $0x10] sm:$0xff] }
0x1356   :  { %1199 = vmatmul.mubr.f32.gmra.mrb[26].mxu0 %v1072_v57  ;;  %v1075_v14 = vld [vmem:[#allocation2 + $0x28] sm:$0xff] }
0x1357   :  { %1204 = vmatprep.mubr.f32.mxu0 %v2900_v3 }
0x13be   :  { %v1446_v31 = vpop.permute.xlu1 %1445 }
0x13bf   :  { %v1448_v58 = vadd.f32 %v2863_v35, %v1446_v31 }
0x13c1   :  { %1449 = vst.msk [vmem:[#allocation3 + $0x8] sm:$0xff] %vm337_vm1, %v1448_v58  ;;  %2378 = vmatmul.mubr.msk.f32.vlgmr.msra.gmra.mrb[14].mxu1 %vm80_vm0, %v1448_v58 }
0x13c2   :  { %1450 = vst.msk [vmem:[#allocation3 + $0x30] sm:$0xff] %vm339_vm2, %v1448_v58  ;;  %v654_v32 = vpop.permute.xlu1 %653  ;;  %2721 = vmatpush1.bf16.msra.mxu1 %v3406_v41  ;;  %1714 = vmatprep.mubr.f32.mxu1 %v2900_v3 }
0x13c3   :  { %656 = vst.msk [vmem:[#allocation2 + $0x20] sm:$0xff] %vm345_vm3, %v654_v32  ;;  %2723 = vmatprep.subr.bf16.mxu1 %v3421_v59 }
0x13c4   :  { %657 = vst.msk [vmem:[#allocation2 + $0x18] sm:$0xff] %vm347_vm4, %v654_v32 }
0x13c5   :  { %753 = vst.msk [vmem:[#allocation2 + $0x20] sm:$0xff] %vm337_vm1, %v3291_v20 }
0x13c6   :  { %754 = vst.msk [vmem:[#allocation2 + $0x18] sm:$0xff] %vm339_vm2, %v3291_v20  ;;  %2725 = vmatpush1.bf16.msra.mxu1 %v3430_v53 }
0x13c7   :  { %2727 = vmatprep.subr.bf16.mxu1 %v3476_v23 }
0x13ca   :  { %2729 = vmatpush1.bf16.msra.mxu1 %v3478_v13 }
0x13cb   :  { %2731 = vmatprep.subr.bf16.mxu1 %v3506_v29 }
0x13ce   :  { %2733 = vmatpush1.bf16.msra.mxu1 %v3508_v30 }
0x13cf   :  { %2751 = vmatprep.subr.bf16.mxu1 %v3404_v40 }
0x1429   :  { %v1200_v47 = vpop.f32.mrb[26].mxu0 }
0x142a   :  { %v1202_v17 = vpop.f32.mrb[27].mxu0  ;;  %v1201_v33 = vadd.f32 %v1200_v47, %v3552_v38 }
0x142b   :  { %v1203_v46 = vadd.f32 %v1202_v17, %v3562_v5 }
0x1494   :  { %v1520_v4 = vpop.f32.mrb[14].mxu1 }
0x1495   :  { %v1525_v34 = vadd.f32 %v1520_v4, %v1201_v33  ;;  %v1522_v36 = vpop.f32.mrb[15].mxu1 }
0x1496   :  { %v1532_v43 = vadd.f32 %v3558_v60, %v1522_v36 }
0x1497   :  { %v2379_v37 = vmul.f32 -1.442695, %v1525_v34 }
0x1499   :  { %2864 = vpow2.f32 %v2379_v37 }
0x14a3   :  { %v2865_v9 = vpop.eup %2864 }
0x14a4   :  { %v1529_v42 = vadd.f32 1.0, %v2865_v9 }
0x14a6   :  { %2866 = vrcp.f32 %v1529_v42 }
0x14b0   :  { %v2867_v45 = vpop.eup %2866 }
0x14b1   :  { %v1533_v49 = vmul.f32 %v2867_v45, %v1532_v43 }
0x14b3   :  { %v1534_v50 = vadd.f32 %v1533_v49, %v1203_v46 }
0x14b5   :  { %2868 = vtanh.f32 %v1534_v50 }
0x14bf   :  { %v2869_v52 = vpop.eup %2868 }
0x14c0   :  { %v1536_v6 = vsub.f32 %v1448_v58, %v2869_v52 }
0x14c2   :  { %1538 = vrot.lane.b32.xlu0 %v1536_v6, %s2901_s4 }
0x14c6   :  { %756 = vrot.lane.b32.xlu0 %v3291_v20, %s2901_s4  ;;  %v1076_v20 = vld [vmem:[#allocation2 + $0x30] sm:$0xff] }
0x1534   :  { %v1539_v7 = vpop.permute.xlu0 %1538 }
0x1535   :  { %v1541_v8 = vmul.f32 %v2867_v45, %v1539_v7 }
0x1537   :  { %1543 = vrot.lane.b32.xlu1 %v1541_v8, %s2901_s4 }
0x1538   :  { %v757_v10 = vpop.permute.xlu0 %756 }
0x1539   :  { %759 = vst.msk [vmem:[#allocation2 + $0x18] sm:$0xff] %vm345_vm3, %v757_v10 }
0x153a   :  { %760 = vst.msk [vmem:[#allocation2 + $0x20] sm:$0xff] %vm347_vm4, %v757_v10 }
0x1540   :  { %v1073_v11 = vld [vmem:[#allocation2 + $0x18] sm:$0xff] }
0x1541   :  { %1205 = vmatmul.mubr.f32.gmra.mrb[28].mxu0 %v1073_v11  ;;  %v1074_v12 = vld [vmem:[#allocation2 + $0x20] sm:$0xff] }
0x1542   :  { %1210 = vmatprep.mubr.f32.mxu0 %v2900_v3 }
0x1545   :  { %1211 = vmatmul.mubr.f32.gmra.mrb[30].mxu0 %v1074_v12 }
0x1546   :  { %1216 = vmatprep.mubr.f32.mxu0 %v2900_v3 }
0x1549   :  { %1217 = vmatmul.mubr.f32.gmra.mrb[32].mxu0 %v1075_v14 }
0x154a   :  { %1222 = vmatprep.mubr.f32.mxu0 %v2900_v3 }
0x154d   :  { %1223 = vmatmul.mubr.f32.gmra.mrb[34].mxu0 %v1076_v20 }
0x154e   :  { %1228 = vmatprep.mubr.f32.mxu0 %v2900_v3 }
0x1551   :  { %1229 = vmatmul.mubr.f32.gmra.mrb[36].mxu0 %v1077_v15 }
0x1552   :  { %1616 = vmatprep.mubr.f32.mxu0 %v2900_v3 }
0x15a9   :  { %v1544_v51 = vpop.permute.xlu1 %1543 }
0x15aa   :  { %v1546_v0 = vadd.f32 %v2869_v52, %v1544_v51 }
0x15ac   :  { %1547 = vst.msk [vmem:[#allocation3 + $0x10] sm:$0xff] %vm337_vm1, %v1546_v0  ;;  %2380 = vmatmul.mubr.msk.f32.vlgmr.msra.gmra.mrb[38].mxu0 %vm80_vm0, %v1546_v0 }
0x15ad   :  { %1548 = vst.msk [vmem:[#allocation3 + $0x28] sm:$0xff] %vm339_vm2, %v1546_v0  ;;  %2737 = vmatpush1.bf16.msra.mxu0 %v3406_v41  ;;  %1812 = vmatprep.mubr.f32.mxu0 %v2900_v3 }
0x15ae   :  { %2739 = vmatprep.subr.bf16.mxu0 %v3421_v59 }
0x15b1   :  { %2741 = vmatpush1.bf16.msra.mxu0 %v3430_v53 }
0x15b2   :  { %2743 = vmatprep.subr.bf16.mxu0 %v3476_v23 }
0x15b5   :  { %2745 = vmatpush1.bf16.msra.mxu0 %v3478_v13 }
0x15b6   :  { %2747 = vmatprep.subr.bf16.mxu0 %v3506_v29 }
0x15b9   :  { %2749 = vmatpush1.bf16.msra.mxu0 %v3508_v30 }
0x15ba   :  { %2767 = vmatprep.subr.bf16.mxu0 %v3404_v40 }
0x1614   :  { %v1206_v55 = vpop.f32.mrb[28].mxu0 }
0x1615   :  { %v1208_v16 = vpop.f32.mrb[29].mxu0  ;;  %v1207_v19 = vadd.f32 %v1206_v55, %v3552_v38 }
0x1616   :  { %v1209_v39 = vadd.f32 %v1208_v16, %v3562_v5 }
0x1618   :  { %v1212_v63 = vpop.f32.mrb[30].mxu0 }
0x1619   :  { %v1214_v27 = vpop.f32.mrb[31].mxu0  ;;  %v1213_v17 = vadd.f32 %v1212_v63, %v3552_v38 }
0x161a   :  { %v1215_v45 = vadd.f32 %v1214_v27, %v3562_v5 }
0x161c   :  { %v3649_v54 = vpop.f32.mrb[32].mxu0 }
0x161d   :  { %v3651_v1 = vpop.f32.mrb[33].mxu0  ;;  %v1219_v11 = vadd.f32 %v3649_v54, %v3552_v38 }
0x1620   :  { %v3653_v2 = vpop.f32.mrb[34].mxu0 }
0x1621   :  { %v3655_v61 = vpop.f32.mrb[35].mxu0  ;;  %v1225_v27 = vadd.f32 %v3653_v2, %v3552_v38 }
0x1624   :  { %v3657_v62 = vpop.f32.mrb[36].mxu0 }
0x1625   :  { %v3659_v18 = vpop.f32.mrb[37].mxu0 }
0x167f   :  { %v1618_v56 = vpop.f32.mrb[38].mxu0 }
0x1680   :  { %v1623_v40 = vadd.f32 %v1618_v56, %v1207_v19  ;;  %v1620_v21 = vpop.f32.mrb[39].mxu0 }
0x1681   :  { %v1630_v26 = vadd.f32 %v3558_v60, %v1620_v21 }
0x1682   :  { %v2381_v24 = vmul.f32 -1.442695, %v1623_v40 }
0x1684   :  { %2870 = vpow2.f32 %v2381_v24 }
0x168e   :  { %v2871_v25 = vpop.eup %2870 }
0x168f   :  { %v1627_v22 = vadd.f32 1.0, %v2871_v25 }
0x1691   :  { %2872 = vrcp.f32 %v1627_v22  ;;  %v1227_v22 = vadd.f32 %v3655_v61, %v3562_v5  ;;  %v1231_v61 = vadd.f32 %v3657_v62, %v3552_v38  ;;  %v2047_v38 = vld [vmem:[%s3815_s9] sm:$0xff]  ;;  %v2048_v62 = vld [vmem:[%s3815_s9 + $0x8] sm:$0xff] }
0x169b   :  { %v2873_v35 = vpop.eup %2872 }
0x169c   :  { %v1631_v44 = vmul.f32 %v2873_v35, %v1630_v26 }
0x169e   :  { %v1632_v28 = vadd.f32 %v1631_v44, %v1209_v39 }
0x16a0   :  { %2874 = vtanh.f32 %v1632_v28 }
0x16aa   :  { %v2875_v48 = vpop.eup %2874 }
0x16ab   :  { %v1634_v57 = vsub.f32 %v1546_v0, %v2875_v48 }
0x16ad   :  { %1636 = vrot.lane.b32.xlu0 %v1634_v57, %s2901_s4 }
0x171f   :  { %v1637_v31 = vpop.permute.xlu0 %1636 }
0x1720   :  { %v1639_v58 = vmul.f32 %v2873_v35, %v1637_v31 }
0x1722   :  { %1641 = vrot.lane.b32.xlu1 %v1639_v58, %s2901_s4 }
0x1794   :  { %v1642_v32 = vpop.permute.xlu1 %1641 }
0x1795   :  { %v1644_v47 = vadd.f32 %v2875_v48, %v1642_v32 }
0x1797   :  { %1645 = vst.msk [vmem:[#allocation3 + $0x18] sm:$0xff] %vm337_vm1, %v1644_v47  ;;  %2382 = vmatmul.mubr.msk.f32.vlgmr.msra.gmra.mrb[16].mxu1 %vm80_vm0, %v1644_v47 }
0x1798   :  { %1646 = vst.msk [vmem:[#allocation3 + $0x20] sm:$0xff] %vm339_vm2, %v1644_v47  ;;  %2753 = vmatpush1.bf16.msra.mxu1 %v3406_v41  ;;  %1910 = vmatprep.mubr.f32.mxu1 %v2900_v3 }
0x1799   :  { %2755 = vmatprep.subr.bf16.mxu1 %v3421_v59 }
0x179c   :  { %2757 = vmatpush1.bf16.msra.mxu1 %v3430_v53 }
0x179d   :  { %2759 = vmatprep.subr.bf16.mxu1 %v3476_v23 }
0x17a0   :  { %2761 = vmatpush1.bf16.msra.mxu1 %v3478_v13 }
0x17a1   :  { %2763 = vmatprep.subr.bf16.mxu1 %v3506_v29 }
0x17a4   :  { %2765 = vmatpush1.bf16.msra.mxu1 %v3508_v30 }
0x186a   :  { %v1716_v33 = vpop.f32.mrb[16].mxu1 }
0x186b   :  { %v1721_v4 = vadd.f32 %v1716_v33, %v1213_v17  ;;  %v1718_v34 = vpop.f32.mrb[17].mxu1 }
0x186c   :  { %v1728_v42 = vadd.f32 %v3558_v60, %v1718_v34 }
0x186d   :  { %v2383_v36 = vmul.f32 -1.442695, %v1721_v4 }
0x186f   :  { %2876 = vpow2.f32 %v2383_v36  ;;  %v1233_v36 = vadd.f32 %v3659_v18, %v3562_v5 }
0x1879   :  { %v2877_v37 = vpop.eup %2876 }
0x187a   :  { %v1725_v9 = vadd.f32 1.0, %v2877_v37 }
0x187c   :  { %2878 = vrcp.f32 %v1725_v9 }
0x1886   :  { %v2879_v43 = vpop.eup %2878 }
0x1887   :  { %v1729_v46 = vmul.f32 %v2879_v43, %v1728_v42  ;;  %v2049_v42 = vld [vmem:[%s3815_s9 + $0x10] sm:$0xff] }
0x1889   :  { %v1730_v49 = vadd.f32 %v1729_v46, %v1215_v45  ;;  %v2051_v46 = vld [vmem:[%s3815_s9 + $0x20] sm:$0xff] }
0x188b   :  { %2880 = vtanh.f32 %v1730_v49  ;;  %v2052_v49 = vld [vmem:[%s3815_s9 + $0x28] sm:$0xff] }
0x1895   :  { %v2881_v50 = vpop.eup %2880 }
0x1896   :  { %v1732_v52 = vsub.f32 %v1644_v47, %v2881_v50 }
0x1898   :  { %1734 = vrot.lane.b32.xlu0 %v1732_v52, %s2901_s4  ;;  %v2053_v52 = vld [vmem:[%s3815_s9 + $0x30] sm:$0xff] }
0x190a   :  { %v1735_v6 = vpop.permute.xlu0 %1734 }
0x190b   :  { %v1737_v7 = vmul.f32 %v2879_v43, %v1735_v6  ;;  %v2054_v6 = vld [vmem:[%s3815_s9 + $0x38] sm:$0xff] }
0x190d   :  { %1739 = vrot.lane.b32.xlu1 %v1737_v7, %s2901_s4  ;;  %v2794_v7 = vpack.c.bf16 %v2054_v6, %v2053_v52 }
0x197f   :  { %v1740_v8 = vpop.permute.xlu1 %1739 }
0x1980   :  { %v1742_v10 = vadd.f32 %v2881_v50, %v1740_v8  ;;  %v2790_v50 = vpack.c.bf16 %v2052_v49, %v2051_v46 }
0x1982   :  { %1743 = vst.msk [vmem:[#allocation3 + $0x20] sm:$0xff] %vm337_vm1, %v1742_v10  ;;  %2384 = vmatmul.mubr.msk.f32.vlgmr.msra.gmra.mrb[40].mxu0 %vm80_vm0, %v1742_v10 }
0x1983   :  { %1744 = vst.msk [vmem:[#allocation3 + $0x18] sm:$0xff] %vm339_vm2, %v1742_v10  ;;  %2769 = vmatpush1.bf16.msra.mxu0 %v3406_v41  ;;  %2008 = vmatprep.mubr.f32.mxu0 %v2900_v3 }
0x1984   :  { %2771 = vmatprep.subr.bf16.mxu0 %v3421_v59 }
0x1987   :  { %2773 = vmatpush1.bf16.msra.mxu0 %v3430_v53 }
0x1988   :  { %2775 = vmatprep.subr.bf16.mxu0 %v3476_v23 }
0x198b   :  { %2777 = vmatpush1.bf16.msra.mxu0 %v3478_v13  ;;  %v1221_v13 = vadd.f32 %v3651_v1, %v3562_v5  ;;  %v2050_v5 = vld [vmem:[%s3815_s9 + $0x18] sm:$0xff] }
0x198c   :  { %2779 = vmatprep.subr.bf16.mxu0 %v3506_v29  ;;  %v2786_v18 = vpack.c.bf16 %v2050_v5, %v2049_v42 }
0x198f   :  { %2781 = vmatpush1.bf16.msra.mxu0 %v3508_v30 }
0x1a55   :  { %v1814_v12 = vpop.f32.mrb[40].mxu0 }
0x1a56   :  { %v1819_v14 = vadd.f32 %v1814_v12, %v1219_v11  ;;  %v1816_v41 = vpop.f32.mrb[41].mxu0 }
0x1a57   :  { %v1826_v53 = vadd.f32 %v3558_v60, %v1816_v41 }
0x1a58   :  { %v2385_v20 = vmul.f32 -1.442695, %v1819_v14 }
0x1a5a   :  { %2882 = vpow2.f32 %v2385_v20 }
0x1a64   :  { %v2883_v3 = vpop.eup %2882 }
0x1a65   :  { %v1823_v59 = vadd.f32 1.0, %v2883_v3  ;;  %v2042_v3 = vld [vmem:[#allocation3 + $0x18] sm:$0xff] }
0x1a67   :  { %2884 = vrcp.f32 %v1823_v59  ;;  %v2043_v59 = vld [vmem:[#allocation3 + $0x20] sm:$0xff] }
0x1a71   :  { %v2885_v23 = vpop.eup %2884 }
0x1a72   :  { %v1827_v29 = vmul.f32 %v2885_v23, %v1826_v53 }
0x1a74   :  { %v1828_v15 = vadd.f32 %v1827_v29, %v1221_v13  ;;  %v2199_v29 = vld [vmem:[%s3816_s11] sm:$0xff] }
0x1a76   :  { %2886 = vtanh.f32 %v1828_v15  ;;  %v2200_v15 = vld [vmem:[%s3816_s11 + $0x8] sm:$0xff] }
0x1a80   :  { %v2887_v30 = vpop.eup %2886 }
0x1a81   :  { %v1830_v51 = vsub.f32 %v1742_v10, %v2887_v30 }
0x1a83   :  { %1832 = vrot.lane.b32.xlu0 %v1830_v51, %s2901_s4  ;;  %v2390_v51 = vld [vmem:[%s3817_s10] ss:$0 sm:$0xff] }
0x1af5   :  { %v1833_v0 = vpop.permute.xlu0 %1832 }
0x1af6   :  { %v1835_v55 = vmul.f32 %v2885_v23, %v1833_v0 }
0x1af8   :  { %1837 = vrot.lane.b32.xlu1 %v1835_v55, %s2901_s4 }
0x1b6a   :  { %v1838_v16 = vpop.permute.xlu1 %1837 }
0x1b6b   :  { %v1840_v63 = vadd.f32 %v2887_v30, %v1838_v16  ;;  %v2798_v30 = vpack.c.bf16 %v2200_v15, %v2199_v29 }
0x1b6d   :  { %1841 = vst.msk [vmem:[#allocation3 + $0x28] sm:$0xff] %vm337_vm1, %v1840_v63  ;;  %2386 = vmatmul.mubr.msk.f32.vlgmr.msra.gmra.mrb[18].mxu1 %vm80_vm0, %v1840_v63  ;;  %2799 = vmatprep.subr.bf16.mxu0 %v2798_v30 }
0x1b6e   :  { %1842 = vst.msk [vmem:[#allocation3 + $0x10] sm:$0xff] %vm339_vm2, %v1840_v63 }
0x1b74   :  { %v2044_v53 = vld [vmem:[#allocation3 + $0x28] sm:$0xff] }
0x1b75   :  { %v2041_v20 = vld [vmem:[#allocation3 + $0x10] sm:$0xff] }
0x1c40   :  { %v1912_v54 = vpop.f32.mrb[18].mxu1 }
0x1c41   :  { %v1917_v1 = vadd.f32 %v1912_v54, %v1225_v27  ;;  %v1914_v19 = vpop.f32.mrb[19].mxu1 }
0x1c42   :  { %v1924_v24 = vadd.f32 %v3558_v60, %v1914_v19 }
0x1c43   :  { %v2387_v56 = vmul.f32 -1.442695, %v1917_v1 }
0x1c45   :  { %2888 = vpow2.f32 %v2387_v56 }
0x1c4f   :  { %v2889_v40 = vpop.eup %2888 }
0x1c50   :  { %v1921_v21 = vadd.f32 1.0, %v2889_v40 }
0x1c52   :  { %2890 = vrcp.f32 %v1921_v21 }
0x1c5c   :  { %v2891_v25 = vpop.eup %2890 }
0x1c5d   :  { %v1925_v26 = vmul.f32 %v2891_v25, %v1924_v24 }
0x1c5f   :  { %v1926_v35 = vadd.f32 %v1925_v26, %v1227_v22 }
0x1c61   :  { %2892 = vtanh.f32 %v1926_v35 }
0x1c6b   :  { %v2893_v39 = vpop.eup %2892 }
0x1c6c   :  { %v1928_v44 = vsub.f32 %v1840_v63, %v2893_v39 }
0x1c6e   :  { %1930 = vrot.lane.b32.xlu0 %v1928_v44, %s2901_s4 }
0x1ce0   :  { %v1931_v2 = vpop.permute.xlu0 %1930 }
0x1ce1   :  { %v1933_v28 = vmul.f32 %v2891_v25, %v1931_v2 }
0x1ce3   :  { %1935 = vrot.lane.b32.xlu1 %v1933_v28, %s2901_s4 }
0x1d55   :  { %v1936_v48 = vpop.permute.xlu1 %1935 }
0x1d56   :  { %v1938_v57 = vadd.f32 %v2893_v39, %v1936_v48 }
0x1d58   :  { %1939 = vst.msk [vmem:[#allocation3 + $0x30] sm:$0xff] %vm337_vm1, %v1938_v57  ;;  %2388 = vmatmul.mubr.msk.f32.vlgmr.msra.gmra.mrb[42].mxu0 %vm80_vm0, %v1938_v57 }
0x1d59   :  { %1940 = vst.msk [vmem:[#allocation3 + $0x8] sm:$0xff] %vm339_vm2, %v1938_v57  ;;  %2801 = vmatpush3.bf16.msra.mxu0 %v2798_v30 }
0x1d5f   :  { %v2045_v23 = vld [vmem:[#allocation3 + $0x30] sm:$0xff] }
0x1d60   :  { %v2040_v41 = vld [vmem:[#allocation3 + $0x8] sm:$0xff] }
0x1e2b   :  { %v2010_v31 = vpop.f32.mrb[42].mxu0 }
0x1e2c   :  { %v2015_v58 = vadd.f32 %v2010_v31, %v1231_v61  ;;  %v2012_v32 = vpop.f32.mrb[43].mxu0 }
0x1e2d   :  { %v2022_v4 = vadd.f32 %v3558_v60, %v2012_v32  ;;  %v2782_v60 = vpack.c.bf16 %v2048_v62, %v2047_v38 }
0x1e2e   :  { %v2389_v47 = vmul.f32 -1.442695, %v2015_v58  ;;  %v2399_v58 = vld [vmem:[%s3818_s12] ss:$0 sm:$0xff] }
0x1e2f   :  { %2783 = vmatprep.subr.bf16.mxu1 %v2782_v60 }
0x1e30   :  { %2894 = vpow2.f32 %v2389_v47  ;;  %2785 = vmatpush3.bf16.msra.mxu1 %v2782_v60 }
0x1e31   :  { %2787 = vmatprep.subr.bf16.mxu1 %v2786_v18 }
0x1e34   :  { %2789 = vmatpush3.bf16.msra.mxu1 %v2786_v18 }
0x1e35   :  { %2791 = vmatprep.subr.bf16.mxu1 %v2790_v50 }
0x1e38   :  { %2793 = vmatpush3.bf16.msra.mxu1 %v2790_v50 }
0x1e39   :  { %2795 = vmatprep.subr.bf16.mxu1 %v2794_v7 }
0x1e3a   :  { %v2895_v17 = vpop.eup %2894 }
0x1e3b   :  { %v2019_v33 = vadd.f32 1.0, %v2895_v17 }
0x1e3c   :  { %2797 = vmatpush3.bf16.msra.mxu1 %v2794_v7 }
0x1e3d   :  { %2896 = vrcp.f32 %v2019_v33 }
0x1e47   :  { %v2897_v34 = vpop.eup %2896 }
0x1e48   :  { %v2023_v37 = vmul.f32 %v2897_v34, %v2022_v4 }
0x1e4a   :  { %v2024_v9 = vadd.f32 %v2023_v37, %v1233_v36 }
0x1e4c   :  { %2898 = vtanh.f32 %v2024_v9 }
0x1e56   :  { %v2899_v43 = vpop.eup %2898 }
0x1e57   :  { %v2026_v45 = vsub.f32 %v1938_v57, %v2899_v43 }
0x1e59   :  { %2028 = vrot.lane.b32.xlu0 %v2026_v45, %s2901_s4 }
0x1ecb   :  { %v2029_v8 = vpop.permute.xlu0 %2028 }
0x1ecc   :  { %v2031_v10 = vmul.f32 %v2897_v34, %v2029_v8 }
0x1ece   :  { %2033 = vrot.lane.b32.xlu1 %v2031_v10, %s2901_s4 }
0x1f40   :  { %v2034_v11 = vpop.permute.xlu1 %2033 }
0x1f41   :  { %v2036_v12 = vadd.f32 %v2899_v43, %v2034_v11 }
0x1f43   :  { %2037 = vst.msk [vmem:[#allocation3 + $0x38] sm:$0xff] %vm337_vm1, %v2036_v12 }
0x1f44   :  { %2038 = vst.msk [vmem:[#allocation3] sm:$0xff] %vm339_vm2, %v2036_v12 }
0x1f4a   :  { %v2046_v13 = vld [vmem:[#allocation3 + $0x38] sm:$0xff] }
0x1f4b   :  { %v2039_v14 = vld [vmem:[#allocation3] sm:$0xff] }
0x1f4c   :  { %2450 = vmatprep.mubr.msk.f32.mxu1 %vm80_vm0, %v2039_v14 }
0x1f4d   :  { %2451 = vmatmul.mubr.msk.f32.vlgmr.msra.gmra.mrb[20].mxu1 %vm80_vm0, %v2040_v41 }
0x1f4e   :  { %2453 = vmatprep.mubr.msk.f32.mxu1 %vm80_vm0, %v2041_v20 }
0x1f51   :  { %2454 = vmatmul.mubr.msk.f32.gmra.mrb[22].mxu1 %vm80_vm0, %v2042_v3 }
0x1f52   :  { %2456 = vmatprep.mubr.msk.f32.mxu1 %vm80_vm0, %v2043_v59 }
0x1f55   :  { %2457 = vmatmul.mubr.msk.f32.gmra.mrb[24].mxu1 %vm80_vm0, %v2044_v53 }
0x1f56   :  { %2459 = vmatprep.mubr.msk.f32.mxu1 %vm80_vm0, %v2045_v23 }
0x1f59   :  { %2460 = vmatmul.mubr.msk.f32.gmra.mrb[26].mxu1 %vm80_vm0, %v2046_v13 }
0x2020   :  { %v2452_v0 = vpop.f32.mrb[20].mxu1 }
0x2021   :  { %v2158_v55 = vadd.f32 %v2452_v0, %v2390_v51  ;;  %v2152_v16 = vpop.f32.mrb[21].mxu1 }
0x2022   :  { %v2153_v63 = vadd.f32 %v2390_v51, %v2152_v16 }
0x2023   :  { %v2192_v1 = vmax.f32 %v2158_v55, 0.0 }
0x2024   :  { %v2191_v27 = vmax.f32 %v2153_v63, 0.0  ;;  %v2455_v54 = vpop.f32.mrb[22].mxu1 }
0x2025   :  { %v2168_v19 = vadd.f32 %v2455_v54, %v2390_v51  ;;  %v2162_v56 = vpop.f32.mrb[23].mxu1 }
0x2026   :  { %v2163_v40 = vadd.f32 %v2390_v51, %v2162_v56  ;;  %2466 = vmatprep.mubr.msk.f32.mxu0 %vm2208_vm5, %v2191_v27 }
0x2027   :  { %2467 = vmatmul.mubr.msk.f32.vlgmr.msra.gmra.mrb[44].mxu0 %vm2208_vm5, %v2192_v1  ;;  %v2194_v25 = vmax.f32 %v2168_v19, 0.0 }
0x2028   :  { %v2193_v21 = vmax.f32 %v2163_v40, 0.0  ;;  %v2458_v24 = vpop.f32.mrb[24].mxu1 }
0x2029   :  { %v2178_v22 = vadd.f32 %v2458_v24, %v2390_v51  ;;  %v2172_v26 = vpop.f32.mrb[25].mxu1 }
0x202a   :  { %v2173_v35 = vadd.f32 %v2390_v51, %v2172_v26  ;;  %2469 = vmatprep.mubr.msk.f32.mxu0 %vm2208_vm5, %v2193_v21 }
0x202b   :  { %2470 = vmatmul.mubr.msk.f32.gmra.mrb[46].mxu0 %vm2208_vm5, %v2194_v25  ;;  %v2196_v2 = vmax.f32 %v2178_v22, 0.0 }
0x202c   :  { %v2195_v39 = vmax.f32 %v2173_v35, 0.0  ;;  %v2461_v44 = vpop.f32.mrb[26].mxu1 }
0x202d   :  { %v2188_v28 = vadd.f32 %v2461_v44, %v2390_v51  ;;  %v2182_v48 = vpop.f32.mrb[27].mxu1 }
0x202e   :  { %v2183_v57 = vadd.f32 %v2390_v51, %v2182_v48  ;;  %2472 = vmatprep.mubr.msk.f32.mxu0 %vm2208_vm5, %v2195_v39 }
0x202f   :  { %2473 = vmatmul.mubr.msk.f32.gmra.mrb[48].mxu0 %vm2208_vm5, %v2196_v2  ;;  %v2198_v31 = vmax.f32 %v2188_v28, 0.0 }
0x2030   :  { %v2197_v61 = vmax.f32 %v2183_v57, 0.0 }
0x2032   :  { %2475 = vmatprep.mubr.msk.f32.mxu0 %vm2208_vm5, %v2197_v61 }
0x2033   :  { %2476 = vmatmul.mubr.msk.f32.gmra.mrb[50].mxu0 %vm2208_vm5, %v2198_v31 }
0x20fa   :  { %v2468_v32 = vpop.f32.mrb[44].mxu0 }
0x20fb   :  { %v2305_v47 = vadd.f32 %v2468_v32, %v2399_v58  ;;  %v2299_v17 = vpop.f32.mrb[45].mxu0 }
0x20fc   :  { %v2300_v33 = vadd.f32 %v2399_v58, %v2299_v17 }
0x20fd   :  { %2339 = vst.msk [vmem:[%s3819_s13 + $0x8] sm:$0xff] %vm2208_vm5, %v2305_v47 }
0x20fe   :  { %2338 = vst.msk [vmem:[%s3819_s13] sm:$0xff] %vm2208_vm5, %v2300_v33  ;;  %v2471_v4 = vpop.f32.mrb[46].mxu0 }
0x20ff   :  { %v2315_v34 = vadd.f32 %v2471_v4, %v2399_v58  ;;  %v2309_v36 = vpop.f32.mrb[47].mxu0 }
0x2100   :  { %v2310_v37 = vadd.f32 %v2399_v58, %v2309_v36 }
0x2101   :  { %2341 = vst.msk [vmem:[%s3819_s13 + $0x18] sm:$0xff] %vm2208_vm5, %v2315_v34 }
0x2102   :  { %2340 = vst.msk [vmem:[%s3819_s13 + $0x10] sm:$0xff] %vm2208_vm5, %v2310_v37  ;;  %v2474_v9 = vpop.f32.mrb[48].mxu0 }
0x2103   :  { %v2325_v38 = vadd.f32 %v2474_v9, %v2399_v58  ;;  %v2319_v62 = vpop.f32.mrb[49].mxu0 }
0x2104   :  { %v2320_v42 = vadd.f32 %v2399_v58, %v2319_v62 }
0x2105   :  { %2343 = vst.msk [vmem:[%s3819_s13 + $0x28] sm:$0xff] %vm2208_vm5, %v2325_v38 }
0x2106   :  { %2342 = vst.msk [vmem:[%s3819_s13 + $0x20] sm:$0xff] %vm2208_vm5, %v2320_v42  ;;  %v2477_v60 = vpop.f32.mrb[50].mxu0 }
0x2107   :  { %v2335_v5 = vadd.f32 %v2477_v60, %v2399_v58  ;;  %v2329_v18 = vpop.f32.mrb[51].mxu0 }
0x2108   :  { %v2330_v43 = vadd.f32 %v2399_v58, %v2329_v18 }
0x2109   :  { %2345 = vst.msk [vmem:[%s3819_s13 + $0x38] sm:$0xff] %vm2208_vm5, %v2335_v5 }
0x210a   :  { %2344 = vst.msk [vmem:[%s3819_s13 + $0x30] sm:$0xff] %vm2208_vm5, %v2330_v43 }

</bundles_post_ra>
